<compile_context>
chip_gen: v6e
topology: v6e:2x2x1
jax: 0.10.0
libtpu: 0.0.40
codegen_flags: <defaults>
</compile_context>

<pallas_src>
import math

import jax
import jax.numpy as jnp
from jax import lax
from jax.experimental import pallas as pl
from jax.experimental.pallas import tpu as pltpu


def _gelu_exact(x):
    # PyTorch F.gelu default (erf-based, exact).
    return 0.5 * x * (1.0 + lax.erf(x * (1.0 / math.sqrt(2.0))))


def feedforward_kernel(x_ref, xt_ref, xb_ref, w1_ref, wd_ref, w2_ref, o_ref):
    # x_ref : (1, TH, W, C)  main rows of this tile
    # xt_ref: (1, 1,  W, C)  row just above the tile (clamped at image top)
    # xb_ref: (1, 1,  W, C)  row just below the tile (clamped at image bottom)
    # w1_ref: (C, hidden)    wd_ref: (3, 3, hidden)    w2_ref: (hidden, C)
    # o_ref : (1, TH, W, C)
    _, TH, W, C = x_ref.shape
    hidden = w1_ref.shape[1]

    r = pl.program_id(1)
    last = pl.num_programs(1) - 1

    x_main = x_ref[...].reshape(TH, W, C)
    xt = xt_ref[...].reshape(1, W, C)
    xb = xb_ref[...].reshape(1, W, C)

    # At the image border the depthwise conv sees zero padding.  Since the 1x1
    # conv has no bias and GELU(0) == 0, zeroing the halo *input* rows gives
    # exactly zero h1 halo rows.
    zero_row = jnp.zeros_like(xt)
    xt = jnp.where(r > 0, xt, zero_row)
    xb = jnp.where(r < last, xb, zero_row)

    x_win = jnp.concatenate([xt, x_main, xb], axis=0)        # (TH+2, W, C)

    # ---- 1x1 conv (channel matmul), recomputed on halo rows, + GELU ----
    # Native dtype into the MXU, f32 accumulation.
    h1 = jnp.dot(x_win.reshape((TH + 2) * W, C), w1_ref[...],
                 preferred_element_type=jnp.float32)          # ((TH+2)*W, hidden)
    h1 = _gelu_exact(h1).reshape(TH + 2, W, hidden)

    # ---- 3x3 depthwise conv (zero pad along W only; H halo already present) ----
    hp = jnp.pad(h1, ((0, 0), (1, 1), (0, 0)))                # (TH+2, W+2, hidden)
    wd = wd_ref[...].astype(jnp.float32)                      # (3, 3, hidden)
    acc = hp[0:TH, 0:W, :] * wd[0, 0]                         # first tap inits acc
    for dy in range(3):
        for dx in range(3):
            if dy == 0 and dx == 0:
                continue
            acc = acc + hp[dy:dy + TH, dx:dx + W, :] * wd[dy, dx]
    h2 = _gelu_exact(acc)                                     # (TH, W, hidden) f32

    # ---- 1x1 conv back to C channels ----
    h2 = h2.reshape(TH * W, hidden).astype(w2_ref.dtype)
    out = jnp.dot(h2, w2_ref[...], preferred_element_type=jnp.float32)
    o_ref[...] = out.reshape(1, TH, W, C).astype(o_ref.dtype)


def feedforward(x, w1, wd, w2, *, tile_h=8):
    """x: [B, H, W, C] (NHWC). Returns [B, H, W, C]."""
    B, H, W, C = x.shape
    hidden = w1.shape[1]
    assert w1.shape == (C, hidden)
    assert wd.shape == (3, 3, hidden)
    assert w2.shape == (hidden, C)

    # Pick a row-tile height that divides H.  For realistic shapes, size TH so
    # ~3 * (TH+2) * W * hidden * 4B of live f32 temporaries (plus double-buffered
    # I/O blocks and weights) stays well under the VMEM limit below.
    th = max(1, min(tile_h, H))
    while H % th:
        th -= 1
    num_row_tiles = H // th

    grid_spec = pltpu.PrefetchScalarGridSpec(
        num_scalar_prefetch=0,
        grid=(B, num_row_tiles),
        in_specs=[
            # Main TH rows of the tile.
            pl.BlockSpec((1, th, W, C), lambda b, r: (b, r, 0, 0)),
            # Halo row above (block size 1 along H => block index == row index),
            # clamped at the top; zeroed in-kernel when r == 0.
            pl.BlockSpec((1, 1, W, C),
                         lambda b, r: (b, jnp.maximum(r * th - 1, 0), 0, 0)),
            # Halo row below, clamped at the bottom; zeroed in-kernel on the last tile.
            pl.BlockSpec((1, 1, W, C),
                         lambda b, r: (b, jnp.minimum((r + 1) * th, H - 1), 0, 0)),
            # Weights: constant index_map -> loaded once, not re-DMA'd per step.
            pl.BlockSpec((C, hidden), lambda b, r: (0, 0)),
            pl.BlockSpec((3, 3, hidden), lambda b, r: (0, 0, 0)),
            pl.BlockSpec((hidden, C), lambda b, r: (0, 0)),
        ],
        out_specs=pl.BlockSpec((1, th, W, C), lambda b, r: (b, r, 0, 0)),
    )

    return pl.pallas_call(
        feedforward_kernel,
        out_shape=jax.ShapeDtypeStruct((B, H, W, C), x.dtype),
        grid_spec=grid_spec,
        compiler_params=pltpu.CompilerParams(
            dimension_semantics=("parallel", "parallel"),
            vmem_limit_bytes=48 * 1024 * 1024,
        ),
    )(x, x, x, w1, wd, w2)


def _reference(x, w1, wd, w2):
    """Pure-JAX reference mirroring the PyTorch module semantics."""
    B, H, W, C = x.shape
    hi = jax.lax.Precision.HIGHEST
    h1 = jax.nn.gelu(jnp.einsum('bhwc,cn->bhwn', x, w1, precision=hi),
                     approximate=False)
    hp = jnp.pad(h1, ((0, 0), (1, 1), (1, 1), (0, 0)))
    acc = jnp.zeros_like(h1)
    for dy in range(3):
        for dx in range(3):
            acc = acc + hp[:, dy:dy + H, dx:dx + W, :] * wd[dy, dx]
    h2 = jax.nn.gelu(acc, approximate=False)
    return jnp.einsum('bhwn,nc->bhwc', h2, w2, precision=hi).astype(x.dtype)


if __name__ == "__main__":
    # Small shapes consistent with the module: dim=4, mult=4 -> hidden=16.
    B, H, W, C = 2, 16, 16, 4
    mult = 4
    hidden = C * mult

    key = jax.random.PRNGKey(0)
    kx, k1, kd, k2 = jax.random.split(key, 4)

    x = jax.random.normal(kx, (B, H, W, C), dtype=jnp.float32)

    # Deterministic synthetic weights (kaiming-uniform-like scale).
    def _uinit(k, shape, fan_in):
        bound = 1.0 / math.sqrt(fan_in)
        return jax.random.uniform(k, shape, jnp.float32, -bound, bound)

    w1 = _uinit(k1, (C, hidden), fan_in=C)          # 1x1 conv: (in, out)
    wd = _uinit(kd, (3, 3, hidden), fan_in=9)       # depthwise 3x3: (kh, kw, ch)
    w2 = _uinit(k2, (hidden, C), fan_in=hidden)     # 1x1 conv: (in, out)

    out = feedforward(x, w1, wd, w2, tile_h=8)
    jax.block_until_ready(out)
    assert out.shape == (B, H, W, C)

    ref = _reference(x, w1, wd, w2)
    max_err = float(jnp.max(jnp.abs(out - ref)))
    assert jnp.allclose(out, ref, rtol=1e-2, atol=1e-2), max_err

    print("KERNEL_OK")
</pallas_src>

<mosaic_0001>
module attributes {stable_mosaic.version = 11 : i64} {
  func.func @feedforward_kernel(%arg0: i32, %arg1: i32, %arg2: memref<1x8x16x4xf32, #tpu.memory_space<vmem>>, %arg3: memref<1x1x16x4xf32, #tpu.memory_space<vmem>>, %arg4: memref<1x1x16x4xf32, #tpu.memory_space<vmem>>, %arg5: memref<4x16xf32, #tpu.memory_space<vmem>>, %arg6: memref<3x3x16xf32, #tpu.memory_space<vmem>>, %arg7: memref<16x4xf32, #tpu.memory_space<vmem>>, %arg8: memref<1x8x16x4xf32, #tpu.memory_space<vmem>>) attributes {dimension_semantics = [#tpu.dimension_semantics<parallel>, #tpu.dimension_semantics<parallel>], iteration_bounds = array<i64: 2, 2>, scalar_prefetch = 0 : i64, scratch_operands = 0 : i64, tpu.core_type = #tpu.core_type<tc>, window_params = [{transform_indices = @transform_0, window_bounds = array<i64: 1, 8, 16, 4>}, {transform_indices = @transform_1, window_bounds = array<i64: 1, 1, 16, 4>}, {transform_indices = @transform_2, window_bounds = array<i64: 1, 1, 16, 4>}, {pipeline_mode = #tpu.pipeline_mode<synchronous>, transform_indices = @transform_3, window_bounds = array<i64: 4, 16>}, {pipeline_mode = #tpu.pipeline_mode<synchronous>, transform_indices = @transform_4, window_bounds = array<i64: 3, 3, 16>}, {pipeline_mode = #tpu.pipeline_mode<synchronous>, transform_indices = @transform_5, window_bounds = array<i64: 16, 4>}, {transform_indices = @transform_6, window_bounds = array<i64: 1, 8, 16, 4>}]} {
    %c0 = arith.constant 0 : index
    %c0_0 = arith.constant 0 : index
    %c0_1 = arith.constant 0 : index
    %c0_2 = arith.constant 0 : index
    %0 = vector.load %arg2[%c0, %c0_0, %c0_1, %c0_2] : memref<1x8x16x4xf32, #tpu.memory_space<vmem>>, vector<1x8x16x4xf32>
    %1 = vector.shape_cast %0 : vector<1x8x16x4xf32> to vector<8x16x4xf32>
    %c0_3 = arith.constant 0 : index
    %c0_4 = arith.constant 0 : index
    %c0_5 = arith.constant 0 : index
    %c0_6 = arith.constant 0 : index
    %2 = vector.load %arg3[%c0_3, %c0_4, %c0_5, %c0_6] : memref<1x1x16x4xf32, #tpu.memory_space<vmem>>, vector<1x1x16x4xf32>
    %3 = vector.shape_cast %2 : vector<1x1x16x4xf32> to vector<1x16x4xf32>
    %c0_7 = arith.constant 0 : index
    %c0_8 = arith.constant 0 : index
    %c0_9 = arith.constant 0 : index
    %c0_10 = arith.constant 0 : index
    %4 = vector.load %arg4[%c0_7, %c0_8, %c0_9, %c0_10] : memref<1x1x16x4xf32, #tpu.memory_space<vmem>>, vector<1x1x16x4xf32>
    %5 = vector.shape_cast %4 : vector<1x1x16x4xf32> to vector<1x16x4xf32>
    %cst = arith.constant 0.000000e+00 : f32
    %6 = vector.broadcast %cst : f32 to vector<1x16x4xf32>
    %c0_i32 = arith.constant 0 : i32
    %7 = arith.cmpi sgt, %arg1, %c0_i32 : i32
    %8 = arith.select %7, %3, %6 : vector<1x16x4xf32>
    %c1_i32 = arith.constant 1 : i32
    %9 = arith.cmpi slt, %arg1, %c1_i32 : i32
    %10 = arith.select %9, %5, %6 : vector<1x16x4xf32>
    %11 = tpu.concatenate %8, %1, %10 in 0 : vector<1x16x4xf32>, vector<8x16x4xf32>, vector<1x16x4xf32> -> vector<10x16x4xf32>
    %12 = vector.shape_cast %11 : vector<10x16x4xf32> to vector<160x4xf32>
    %c0_11 = arith.constant 0 : index
    %c0_12 = arith.constant 0 : index
    %13 = vector.load %arg5[%c0_11, %c0_12] : memref<4x16xf32, #tpu.memory_space<vmem>>, vector<4x16xf32>
    %cst_13 = arith.constant dense<0.000000e+00> : vector<160x16xf32>
    %14 = tpu.matmul %12, %13, %cst_13 {dimension_numbers = #tpu.dot_dimension_numbers<[1], [0], [0], [1], [0, 0, 1, 1], [], []>} : vector<160x4xf32>, vector<4x16xf32>, vector<160x16xf32> -> vector<160x16xf32>
    %cst_14 = arith.constant 5.000000e-01 : f32
    %15 = vector.broadcast %cst_14 : f32 to vector<160x16xf32>
    %16 = arith.mulf %15, %14 : vector<160x16xf32>
    %cst_15 = arith.constant 0.707106769 : f32
    %17 = vector.broadcast %cst_15 : f32 to vector<160x16xf32>
    %18 = arith.mulf %14, %17 : vector<160x16xf32>
    %19 = math.erf %18 : vector<160x16xf32>
    %cst_16 = arith.constant 1.000000e+00 : f32
    %20 = vector.broadcast %cst_16 : f32 to vector<160x16xf32>
    %21 = arith.addf %20, %19 : vector<160x16xf32>
    %22 = arith.mulf %16, %21 : vector<160x16xf32>
    %23 = vector.shape_cast %22 : vector<160x16xf32> to vector<10x16x16xf32>
    %c0_i32_17 = arith.constant 0 : i32
    %24 = arith.sitofp %c0_i32_17 : i32 to f32
    %25 = vector.broadcast %24 : f32 to vector<10x1x16xf32>
    %26 = tpu.concatenate %25, %23 in 1 : vector<10x1x16xf32>, vector<10x16x16xf32> -> vector<10x17x16xf32>
    %27 = vector.broadcast %24 : f32 to vector<10x1x16xf32>
    %28 = tpu.concatenate %26, %27 in 1 : vector<10x17x16xf32>, vector<10x1x16xf32> -> vector<10x18x16xf32>
    %c0_18 = arith.constant 0 : index
    %c0_19 = arith.constant 0 : index
    %c0_20 = arith.constant 0 : index
    %29 = vector.load %arg6[%c0_18, %c0_19, %c0_20] : memref<3x3x16xf32, #tpu.memory_space<vmem>>, vector<3x3x16xf32>
    %30 = vector.extract_strided_slice %28 {offsets = [0, 0, 0], sizes = [8, 16, 16], strides = [1, 1, 1]} : vector<10x18x16xf32> to vector<8x16x16xf32>
    %31 = vector.extract_strided_slice %29 {offsets = [0, 0, 0], sizes = [1, 1, 16], strides = [1, 1, 1]} : vector<3x3x16xf32> to vector<1x1x16xf32>
    %32 = vector.shape_cast %31 : vector<1x1x16xf32> to vector<16xf32>
    %33 = vector.shape_cast %32 : vector<16xf32> to vector<1x1x16xf32>
    %34 = vector.broadcast %33 : vector<1x1x16xf32> to vector<8x16x16xf32>
    %35 = arith.mulf %30, %34 : vector<8x16x16xf32>
    %36 = vector.extract_strided_slice %28 {offsets = [0, 1, 0], sizes = [8, 16, 16], strides = [1, 1, 1]} : vector<10x18x16xf32> to vector<8x16x16xf32>
    %37 = vector.extract_strided_slice %29 {offsets = [0, 1, 0], sizes = [1, 1, 16], strides = [1, 1, 1]} : vector<3x3x16xf32> to vector<1x1x16xf32>
    %38 = vector.shape_cast %37 : vector<1x1x16xf32> to vector<16xf32>
    %39 = vector.shape_cast %38 : vector<16xf32> to vector<1x1x16xf32>
    %40 = vector.broadcast %39 : vector<1x1x16xf32> to vector<8x16x16xf32>
    %41 = arith.mulf %36, %40 : vector<8x16x16xf32>
    %42 = arith.addf %35, %41 : vector<8x16x16xf32>
    %43 = vector.extract_strided_slice %28 {offsets = [0, 2, 0], sizes = [8, 16, 16], strides = [1, 1, 1]} : vector<10x18x16xf32> to vector<8x16x16xf32>
    %44 = vector.extract_strided_slice %29 {offsets = [0, 2, 0], sizes = [1, 1, 16], strides = [1, 1, 1]} : vector<3x3x16xf32> to vector<1x1x16xf32>
    %45 = vector.shape_cast %44 : vector<1x1x16xf32> to vector<16xf32>
    %46 = vector.shape_cast %45 : vector<16xf32> to vector<1x1x16xf32>
    %47 = vector.broadcast %46 : vector<1x1x16xf32> to vector<8x16x16xf32>
    %48 = arith.mulf %43, %47 : vector<8x16x16xf32>
    %49 = arith.addf %42, %48 : vector<8x16x16xf32>
    %50 = vector.extract_strided_slice %28 {offsets = [1, 0, 0], sizes = [8, 16, 16], strides = [1, 1, 1]} : vector<10x18x16xf32> to vector<8x16x16xf32>
    %51 = vector.extract_strided_slice %29 {offsets = [1, 0, 0], sizes = [1, 1, 16], strides = [1, 1, 1]} : vector<3x3x16xf32> to vector<1x1x16xf32>
    %52 = vector.shape_cast %51 : vector<1x1x16xf32> to vector<16xf32>
    %53 = vector.shape_cast %52 : vector<16xf32> to vector<1x1x16xf32>
    %54 = vector.broadcast %53 : vector<1x1x16xf32> to vector<8x16x16xf32>
    %55 = arith.mulf %50, %54 : vector<8x16x16xf32>
    %56 = arith.addf %49, %55 : vector<8x16x16xf32>
    %57 = vector.extract_strided_slice %28 {offsets = [1, 1, 0], sizes = [8, 16, 16], strides = [1, 1, 1]} : vector<10x18x16xf32> to vector<8x16x16xf32>
    %58 = vector.extract_strided_slice %29 {offsets = [1, 1, 0], sizes = [1, 1, 16], strides = [1, 1, 1]} : vector<3x3x16xf32> to vector<1x1x16xf32>
    %59 = vector.shape_cast %58 : vector<1x1x16xf32> to vector<16xf32>
    %60 = vector.shape_cast %59 : vector<16xf32> to vector<1x1x16xf32>
    %61 = vector.broadcast %60 : vector<1x1x16xf32> to vector<8x16x16xf32>
    %62 = arith.mulf %57, %61 : vector<8x16x16xf32>
    %63 = arith.addf %56, %62 : vector<8x16x16xf32>
    %64 = vector.extract_strided_slice %28 {offsets = [1, 2, 0], sizes = [8, 16, 16], strides = [1, 1, 1]} : vector<10x18x16xf32> to vector<8x16x16xf32>
    %65 = vector.extract_strided_slice %29 {offsets = [1, 2, 0], sizes = [1, 1, 16], strides = [1, 1, 1]} : vector<3x3x16xf32> to vector<1x1x16xf32>
    %66 = vector.shape_cast %65 : vector<1x1x16xf32> to vector<16xf32>
    %67 = vector.shape_cast %66 : vector<16xf32> to vector<1x1x16xf32>
    %68 = vector.broadcast %67 : vector<1x1x16xf32> to vector<8x16x16xf32>
    %69 = arith.mulf %64, %68 : vector<8x16x16xf32>
    %70 = arith.addf %63, %69 : vector<8x16x16xf32>
    %71 = vector.extract_strided_slice %28 {offsets = [2, 0, 0], sizes = [8, 16, 16], strides = [1, 1, 1]} : vector<10x18x16xf32> to vector<8x16x16xf32>
    %72 = vector.extract_strided_slice %29 {offsets = [2, 0, 0], sizes = [1, 1, 16], strides = [1, 1, 1]} : vector<3x3x16xf32> to vector<1x1x16xf32>
    %73 = vector.shape_cast %72 : vector<1x1x16xf32> to vector<16xf32>
    %74 = vector.shape_cast %73 : vector<16xf32> to vector<1x1x16xf32>
    %75 = vector.broadcast %74 : vector<1x1x16xf32> to vector<8x16x16xf32>
    %76 = arith.mulf %71, %75 : vector<8x16x16xf32>
    %77 = arith.addf %70, %76 : vector<8x16x16xf32>
    %78 = vector.extract_strided_slice %28 {offsets = [2, 1, 0], sizes = [8, 16, 16], strides = [1, 1, 1]} : vector<10x18x16xf32> to vector<8x16x16xf32>
    %79 = vector.extract_strided_slice %29 {offsets = [2, 1, 0], sizes = [1, 1, 16], strides = [1, 1, 1]} : vector<3x3x16xf32> to vector<1x1x16xf32>
    %80 = vector.shape_cast %79 : vector<1x1x16xf32> to vector<16xf32>
    %81 = vector.shape_cast %80 : vector<16xf32> to vector<1x1x16xf32>
    %82 = vector.broadcast %81 : vector<1x1x16xf32> to vector<8x16x16xf32>
    %83 = arith.mulf %78, %82 : vector<8x16x16xf32>
    %84 = arith.addf %77, %83 : vector<8x16x16xf32>
    %85 = vector.extract_strided_slice %28 {offsets = [2, 2, 0], sizes = [8, 16, 16], strides = [1, 1, 1]} : vector<10x18x16xf32> to vector<8x16x16xf32>
    %86 = vector.extract_strided_slice %29 {offsets = [2, 2, 0], sizes = [1, 1, 16], strides = [1, 1, 1]} : vector<3x3x16xf32> to vector<1x1x16xf32>
    %87 = vector.shape_cast %86 : vector<1x1x16xf32> to vector<16xf32>
    %88 = vector.shape_cast %87 : vector<16xf32> to vector<1x1x16xf32>
    %89 = vector.broadcast %88 : vector<1x1x16xf32> to vector<8x16x16xf32>
    %90 = arith.mulf %85, %89 : vector<8x16x16xf32>
    %91 = arith.addf %84, %90 : vector<8x16x16xf32>
    %cst_21 = arith.constant 5.000000e-01 : f32
    %92 = vector.broadcast %cst_21 : f32 to vector<8x16x16xf32>
    %93 = arith.mulf %92, %91 : vector<8x16x16xf32>
    %cst_22 = arith.constant 0.707106769 : f32
    %94 = vector.broadcast %cst_22 : f32 to vector<8x16x16xf32>
    %95 = arith.mulf %91, %94 : vector<8x16x16xf32>
    %96 = math.erf %95 : vector<8x16x16xf32>
    %cst_23 = arith.constant 1.000000e+00 : f32
    %97 = vector.broadcast %cst_23 : f32 to vector<8x16x16xf32>
    %98 = arith.addf %97, %96 : vector<8x16x16xf32>
    %99 = arith.mulf %93, %98 : vector<8x16x16xf32>
    %100 = vector.shape_cast %99 : vector<8x16x16xf32> to vector<128x16xf32>
    %c0_24 = arith.constant 0 : index
    %c0_25 = arith.constant 0 : index
    %101 = vector.load %arg7[%c0_24, %c0_25] : memref<16x4xf32, #tpu.memory_space<vmem>>, vector<16x4xf32>
    %cst_26 = arith.constant dense<0.000000e+00> : vector<128x4xf32>
    %102 = tpu.matmul %100, %101, %cst_26 {dimension_numbers = #tpu.dot_dimension_numbers<[1], [0], [0], [1], [0, 0, 1, 1], [], []>} : vector<128x16xf32>, vector<16x4xf32>, vector<128x4xf32> -> vector<128x4xf32>
    %103 = vector.shape_cast %102 : vector<128x4xf32> to vector<1x8x16x4xf32>
    %c0_27 = arith.constant 0 : index
    %c0_28 = arith.constant 0 : index
    %c0_29 = arith.constant 0 : index
    %c0_30 = arith.constant 0 : index
    %104 = vector.load %arg8[%c0_27, %c0_28, %c0_29, %c0_30] : memref<1x8x16x4xf32, #tpu.memory_space<vmem>>, vector<1x8x16x4xf32>
    tpu.vector_store %arg8[%c0_27, %c0_28, %c0_29, %c0_30], %103 {strides = array<i32>} : memref<1x8x16x4xf32, #tpu.memory_space<vmem>>, vector<1x8x16x4xf32>,
    return
  }
  func.func @transform_0(%arg0: i32, %arg1: i32) -> (i32, i32, i32, i32) {
    %c0_i32 = arith.constant 0 : i32
    %c0_i32_0 = arith.constant 0 : i32
    %c0_i32_1 = arith.constant 0 : i32
    return %arg0, %arg1, %c0_i32, %c0_i32_0 : i32, i32, i32, i32
  }
  func.func @transform_1(%arg0: i32, %arg1: i32) -> (i32, i32, i32, i32) {
    %c8_i32 = arith.constant 8 : i32
    %0 = arith.muli %arg1, %c8_i32 : i32
    %c1_i32 = arith.constant 1 : i32
    %1 = arith.subi %0, %c1_i32 : i32
    %c0_i32 = arith.constant 0 : i32
    %2 = arith.maxsi %1, %c0_i32 : i32
    %c0_i32_0 = arith.constant 0 : i32
    %c0_i32_1 = arith.constant 0 : i32
    %c0_i32_2 = arith.constant 0 : i32
    return %arg0, %2, %c0_i32_0, %c0_i32_1 : i32, i32, i32, i32
  }
  func.func @transform_2(%arg0: i32, %arg1: i32) -> (i32, i32, i32, i32) {
    %c1_i32 = arith.constant 1 : i32
    %0 = arith.addi %arg1, %c1_i32 : i32
    %c8_i32 = arith.constant 8 : i32
    %1 = arith.muli %0, %c8_i32 : i32
    %c15_i32 = arith.constant 15 : i32
    %2 = arith.minsi %1, %c15_i32 : i32
    %c0_i32 = arith.constant 0 : i32
    %c0_i32_0 = arith.constant 0 : i32
    %c0_i32_1 = arith.constant 0 : i32
    return %arg0, %2, %c0_i32, %c0_i32_0 : i32, i32, i32, i32
  }
  func.func @transform_3(%arg0: i32, %arg1: i32) -> (i32, i32) {
    %c0_i32 = arith.constant 0 : i32
    %c0_i32_0 = arith.constant 0 : i32
    %c0_i32_1 = arith.constant 0 : i32
    return %c0_i32, %c0_i32_0 : i32, i32
  }
  func.func @transform_4(%arg0: i32, %arg1: i32) -> (i32, i32, i32) {
    %c0_i32 = arith.constant 0 : i32
    %c0_i32_0 = arith.constant 0 : i32
    %c0_i32_1 = arith.constant 0 : i32
    %c0_i32_2 = arith.constant 0 : i32
    return %c0_i32, %c0_i32_0, %c0_i32_1 : i32, i32, i32
  }
  func.func @transform_5(%arg0: i32, %arg1: i32) -> (i32, i32) {
    %c0_i32 = arith.constant 0 : i32
    %c0_i32_0 = arith.constant 0 : i32
    %c0_i32_1 = arith.constant 0 : i32
    return %c0_i32, %c0_i32_0 : i32, i32
  }
  func.func @transform_6(%arg0: i32, %arg1: i32) -> (i32, i32, i32, i32) {
    %c0_i32 = arith.constant 0 : i32
    %c0_i32_0 = arith.constant 0 : i32
    %c0_i32_1 = arith.constant 0 : i32
    return %arg0, %arg1, %c0_i32, %c0_i32_0 : i32, i32, i32, i32
  }
}

</mosaic_0001>

<bundles_post_ra>
// kernel: tpu_custom_call.1
= control target key start
LH: loop header
LB: loop body
LE: loop exit
PB: predicated region body
PF: predicated region fallthrough
CT: control target
= control target key end

     0   :  { %s2541_s21 = smov 0   ;;  %s2543_s22 = smov 0   ;;  %s3756_s0 = inlined_call_operand.vmem [shape: f32[2,16,16,4], index: 0, kind: input, shape index: {}]   ;;  %s3757_s1 = inlined_call_operand.vmem [shape: f32[2,16,16,4], index: 1, kind: input, shape index: {}]   ;;  %s3758_s2 = inlined_call_operand.vmem [shape: f32[2,16,16,4], index: 2, kind: input, shape index: {}]   ;;  %s3759_s3 = inlined_call_operand.vmem [shape: f32[4,16], index: 3, kind: input, shape index: {}]   ;;  %s3760_s4 = inlined_call_operand.vmem [shape: f32[3,3,16], index: 4, kind: input, shape index: {}]   ;;  %s3761_s5 = inlined_call_operand.vmem [shape: f32[16,4], index: 5, kind: input, shape index: {}]   ;;  %s3762_s6 = inlined_call_operand.vmem [shape: f32[2,16,16,4], index: 6, kind: output, shape index: {}]  }
   0x1   :  { %s2545_s23 = smov 0   ;;  %s2547_s24 = smov 0  }
   0x2   :  { %s2549_s25 = smov 0  }
   0x3 LB: > { %s25_s26 = sadd.s32 1, %s2496_s23  ;;  %s28_s27 = sadd.s32 1, %s2500_s24  ;;  %s2504_s25 = sphi %s2549_s25, %s16_s25   ;;  %s2500_s24 = sphi %s2547_s24, %s4012_s24   ;;  %s2496_s23 = sphi %s2545_s23, %s4011_s23   ;;  %s2492_s22 = sphi %s2543_s22, %s4010_s22   ;;  %s2488_s21 = sphi %s2541_s21, %s4009_s21  }
   0x4   : > { %p26_p0 = scmp.ge.s32.totalorder %s25_s26, 2  ;;  %p2168_p1 = scmp.ge.s32.totalorder %s2504_s25, 1 }
   0x5   : > { %p298_p2 = scmp.lt.s32.totalorder %s2504_s25, 5 }
   0x6   : > { %s4014_s26 = smov (%p26_p0, %s25_s26), 0  ;;  %s4016_s27 = smov (!%p26_p0, %s28_s27), %s2500_s24 }
   0x7   : > { %p299_p3 = pnand %p2168_p1, %p298_p2  ;;  %p30_p4 = scmp.ge.s32.totalorder %s4016_s27, 2 }
   0x9   : > { %s4018_s27 = smov (%p30_p4, %s4016_s27), 0  ;;  %302 = sbr.rel (%p299_p3) target bundleno = 655 (0x28f), region = 44 }
   0xe   : > { %v452_v0 = vld [vmem:[%s3759_s3] sm:$0xf]  ;;  %vm514_vm0 = vcmask 1043456   ;;  %s2577_s30 = sshll.u32 %s2488_s21, 3  ;;  %p365_p5 = scmp.lt.s32.totalorder %s2492_s22, 1  ;;  %vm453_vm1 = vcmask 31744   ;;  %v887_v26 = vlaneseq }
   0xf   : > { %2280 = vmatprep.subr.msk.mxu0 %vm514_vm0, %v452_v0  ;;  %p367_p6 = scmp.lt.s32.totalorder %s2577_s30, 15  ;;  %s2174_s7 = sadd.s32 4294967295, %s2577_s30  ;;  %2340 = vmatprep.subr.msk.mxu1 %vm514_vm0, %v452_v0  ;;  %v1806_v21 = vld [vmem:[%s3761_s5 + $0x8] sm:$0xff]  ;;  %v1805_v22 = vld [vmem:[%s3761_s5] sm:$0xff]  ;;  %vm803_vm2 = vcmask 1040384   ;;  %vm959_vm3 = vcmask 1046528  }
  0x10   : > { %2281 = vmatpush3.msk.msra.mxu0 %vm514_vm0, %v452_v0  ;;  %s4020_s22 = smov (!%p365_p5, %s2492_s22), 1  ;;  %2341 = vmatpush3.msk.msra.mxu1 %vm514_vm0, %v452_v0  ;;  %p377_p7 = scmp.gt.s32.totalorder %s2174_s7, 0  ;;  %v888_v31 = vshrl.u32 %v887_v26, 7  ;;  %v884_v38 = vld [vmem:[%s3760_s4] sm:$0x7]  ;;  %vm1084_vm4 = vcmask 1045504  }
  0x11   : > { %s368_s8 = scalar_select %p367_p6, %s2577_s30, 15  ;;  %2312 = vmatprep.subr.mxu1 %v1806_v21  ;;  %v885_v39 = vld [vmem:[%s3760_s4 + $0x4] sm:$0x7]  ;;  %v886_v42 = vld [vmem:[%s3760_s4 + $0x8] sm:$0x7]  ;;  %vm1807_vm5 = vcmask 130048  }
  0x12   : > { %s2582_s9 = sshll.u32 %s4020_s22, 5  ;;  %p440_p8 = scmp.gt.s32.totalorder %s2488_s21, 0  ;;  %v909_v35 = vsub.s32 1, %v888_v31  ;;  %v1034_v36 = vsub.s32 2, %v888_v31  ;;  %v889_v37 = vsub.s32 0, %v888_v31 }
  0x13   : > { %s2170_s10 = sshll.u32 %s368_s8, 1  ;;  %p2175_p9 = scmp.lt.s32.totalorder %s2174_s7, 15 }
  0x14   : > { %s2585_s11 = sadd.s32 %s2582_s9, %s2170_s10  ;;  %s4022_s7 = smov (!%p377_p7, %s2174_s7), 0  ;;  %v2667_v46 = vrot.slane %v884_v38, %v909_v35  ;;  %v2669_v47 = vrot.slane %v884_v38, %v1034_v36  ;;  %v2671_v48 = vrot.slane %v884_v38, %v889_v37  ;;  %v2673_v49 = vrot.slane %v885_v39, %v909_v35 }
  0x15   : > { %s2172_s12 = sshll.u32 %s2585_s11, 3  ;;  %s4024_s7 = smov (!%p2175_p9, %s4022_s7), 15  ;;  %v2675_v51 = vrot.slane %v885_v39, %v1034_v36  ;;  %v2677_v52 = vrot.slane %v885_v39, %v889_v37  ;;  %v2679_v53 = vrot.slane %v886_v42, %v909_v35  ;;  %v2681_v61 = vrot.slane %v886_v42, %v1034_v36 }
  0x16   : > { %s2594_s15 = scalar_lea.vmem %s3756_s0, %s2172_s12  ;;  %s2240_s16 = sadd.s32 8, %s2577_s30  ;;  %v2683_v63 = vrot.slane %v886_v42, %v889_v37 }
  0x17   : > { %s2180_s17 = sshll.u32 %s4024_s7, 1  ;;  %p2598_p10 = scmp.lt.s32.totalorder %s2240_s16, 15  ;;  %v420_v2 = vld [vmem:[%s2594_s15] sm:$0xff]  ;;  %v421_v4 = vld [vmem:[%s2594_s15 + $0x8] sm:$0xff]  ;;  %v422_v5 = vld [vmem:[%s2594_s15 + $0x10] sm:$0xff] }
  0x18   : > { %s385_s18 = sadd.s32 %s2180_s17, %s2582_s9  ;;  %p446_p11 = scmp.lt.s32.totalorder %s2488_s21, 1  ;;  %v423_v6 = vld [vmem:[%s2594_s15 + $0x18] sm:$0xff]  ;;  %v424_v7 = vld [vmem:[%s2594_s15 + $0x20] sm:$0xff]  ;;  %v425_v9 = vld [vmem:[%s2594_s15 + $0x28] sm:$0xff] }
  0x19   : > { %s2182_s19 = sshll.u32 %s385_s18, 3  ;;  %s4026_s16 = smov (!%p2598_p10, %s2240_s16), 15  ;;  %v426_v11 = vld [vmem:[%s2594_s15 + $0x30] sm:$0xff]  ;;  %v427_v12 = vld [vmem:[%s2594_s15 + $0x38] sm:$0xff]  ;;  %v428_v13 = vld [vmem:[%s2594_s15 + $0x40] sm:$0xff] }
  0x1a   : > { %s387_s29 = scalar_lea.vmem %s3757_s1, %s2182_s19  ;;  %s4028_s16 = smov (!%p2598_p10, %s4026_s16), 15  ;;  %v429_v14 = vld [vmem:[%s2594_s15 + $0x48] sm:$0xff]  ;;  %v430_v15 = vld [vmem:[%s2594_s15 + $0x50] sm:$0xff]  ;;  %v431_v16 = vld [vmem:[%s2594_s15 + $0x58] sm:$0xff] }
  0x1b   : > { %s2383_s8 = scalar_select %p440_p8, 255, 0  ;;  %v432_v17 = vld [vmem:[%s2594_s15 + $0x60] sm:$0xff]  ;;  %v433_v18 = vld [vmem:[%s2594_s15 + $0x68] sm:$0xff]  ;;  %v434_v19 = vld [vmem:[%s2594_s15 + $0x70] sm:$0xff] }
  0x1c   : > { %s2187_s30 = sshll.u32 %s4028_s16, 1  ;;  %v435_v20 = vld [vmem:[%s2594_s15 + $0x78] sm:$0xff] }
  0x1d   : > { %v2384_v1 = vld [vmem:[%s387_s29] sm:%s2383_s8]  ;;  %v2387_v3 = vld [vmem:[%s387_s29 + $0x8] sm:%s2383_s8]  ;;  %s402_s7 = sadd.s32 %s2187_s30, %s2582_s9 }
  0x1e   : > { %2282 = vmatprep.mubr.msk.f32.mxu0 %vm453_vm1, %v2384_v1  ;;  %s2189_s10 = sshll.u32 %s402_s7, 3 }
  0x1f   : > { %2283 = vmatmul.mubr.msk.f32.vlgmr.msra.gmra.mxu0 %vm453_vm1, %v2387_v3  ;;  %s404_s17 = scalar_lea.vmem %s3758_s2, %s2189_s10  ;;  %s3707_s10 = scalar_lea.vmem %s3762_s6, %s2172_s12 }
  0x20   : > { %2285 = vmatprep.mubr.msk.f32.mxu0 %vm453_vm1, %v420_v2  ;;  %s2389_s18 = scalar_select %p446_p11, 255, 0 }
  0x22   : > { %v2390_v8 = vld [vmem:[%s404_s17] sm:%s2389_s18]  ;;  %v2393_v10 = vld [vmem:[%s404_s17 + $0x8] sm:%s2389_s18] }
  0x23   : > { %2286 = vmatmul.mubr.msk.f32.gmra.mxu0 %vm453_vm1, %v421_v4  ;;  %2309 = vmatprep.mubr.msk.f32.mxu1 %vm453_vm1, %v2390_v8 }
  0x24   : > { %2288 = vmatprep.mubr.msk.f32.mxu0 %vm453_vm1, %v422_v5  ;;  %2310 = vmatmul.mubr.msk.f32.vlgmr.msra.gmra.mxu1 %vm453_vm1, %v2393_v10 }
  0x25   : > { %2313 = vmatpush3.msra.mxu1 %v1806_v21 }
  0x26   : > { %2314 = vmatprep.subr.mxu1 %v1805_v22 }
  0x27   : > { %2289 = vmatmul.mubr.msk.f32.gmra.mxu0 %vm453_vm1, %v423_v6  ;;  %2315 = vmatpush3.msra.mxu1 %v1805_v22 }
  0x28   : > { %2291 = vmatprep.mubr.msk.f32.mxu0 %vm453_vm1, %v424_v7 }
  0x2b   : > { %2292 = vmatmul.mubr.msk.f32.gmra.mxu0 %vm453_vm1, %v425_v9 }
  0x2c   : > { %2294 = vmatprep.mubr.msk.f32.mxu0 %vm453_vm1, %v426_v11 }
  0x2f   : > { %2295 = vmatmul.mubr.msk.f32.gmra.mxu0 %vm453_vm1, %v427_v12 }
  0x30   : > { %2297 = vmatprep.mubr.msk.f32.mxu0 %vm453_vm1, %v428_v13 }
  0x33   : > { %2298 = vmatmul.mubr.msk.f32.gmra.mxu0 %vm453_vm1, %v429_v14 }
  0x34   : > { %2300 = vmatprep.mubr.msk.f32.mxu0 %vm453_vm1, %v430_v15 }
  0x37   : > { %2301 = vmatmul.mubr.msk.f32.gmra.mxu0 %vm453_vm1, %v431_v16 }
  0x38   : > { %2303 = vmatprep.mubr.msk.f32.mxu0 %vm453_vm1, %v432_v17 }
  0x3b   : > { %2304 = vmatmul.mubr.msk.f32.gmra.mxu0 %vm453_vm1, %v433_v18 }
  0x3c   : > { %2306 = vmatprep.mubr.msk.f32.mxu0 %vm453_vm1, %v434_v19 }
  0x3f   : > { %2307 = vmatmul.mubr.msk.f32.gmra.mxu0 %vm453_vm1, %v435_v20 }
  0xdf   : > { %v2284_v23 = vpop.f32.mrf.mxu0 }
  0xe0   : > { %v704_v24 = vmul.f32 0.70710677, %v2284_v23  ;;  %v684_v55 = vmul.f32 0.5, %v2284_v23 }
  0xe1   : > { %v584_v25 = vpop.f32.mrf.mxu0 }
  0xe2   : > { %2394 = verf.f32 %v704_v24  ;;  %v703_v27 = vmul.f32 0.70710677, %v584_v25  ;;  %v683_v60 = vmul.f32 0.5, %v584_v25 }
  0xe3   : > { %v2287_v28 = vpop.f32.mrf.mxu0 }
  0xe4   : > { %2396 = verf.f32 %v703_v27  ;;  %v706_v29 = vmul.f32 0.70710677, %v2287_v28  ;;  %v2311_v44 = vpop.f32.mrf.mxu1  ;;  %v686_v2 = vmul.f32 0.5, %v2287_v28 }
  0xe5   : > { %v594_v30 = vpop.f32.mrf.mxu0  ;;  %v722_v57 = vmul.f32 0.70710677, %v2311_v44  ;;  %v2689_v8 = vmul.f32 0.5, %v2311_v44 }
  0xe6   : > { %2398 = verf.f32 %v706_v29  ;;  %v705_v32 = vmul.f32 0.70710677, %v594_v30  ;;  %v674_v58 = vpop.f32.mrf.mxu1  ;;  %v685_v3 = vmul.f32 0.5, %v594_v30 }
  0xe7   : > { %v2290_v33 = vpop.f32.mrf.mxu0  ;;  %v721_v9 = vmul.f32 0.70710677, %v674_v58  ;;  %v2696_v24 = vmul.f32 0.5, %v674_v58 }
  0xe8   : > { %2400 = verf.f32 %v705_v32  ;;  %v708_v40 = vmul.f32 0.70710677, %v2290_v33  ;;  %v2685_v6 = vmul.f32 0.5, %v2290_v33 }
  0xe9   : > { %v604_v34 = vpop.f32.mrf.mxu0 }
  0xea   : > { %v707_v43 = vmul.f32 0.70710677, %v604_v34  ;;  %2402 = verf.f32 %v708_v40  ;;  %v2687_v7 = vmul.f32 0.5, %v604_v34 }
  0xeb   : > { %v2293_v41 = vpop.f32.mrf.mxu0 }
  0xec   : > { %2404 = verf.f32 %v707_v43  ;;  %v710_v62 = vmul.f32 0.70710677, %v2293_v41  ;;  %v2691_v14 = vmul.f32 0.5, %v2293_v41 }
  0xed   : > { %v614_v45 = vpop.f32.mrf.mxu0  ;;  %2406 = verf.f32 %v722_v57 }
  0xee   : > { %2408 = verf.f32 %v710_v62  ;;  %v709_v15 = vmul.f32 0.70710677, %v614_v45  ;;  %v2694_v22 = vmul.f32 0.5, %v614_v45 }
  0xef   : > { %v2395_v50 = vpop.eup %2394  ;;  %v2296_v54 = vpop.f32.mrf.mxu0  ;;  %2410 = verf.f32 %v721_v9 }
  0xf0   : > { %v744_v56 = vadd.f32 1.0, %v2395_v50  ;;  %v712_v16 = vmul.f32 0.70710677, %v2296_v54  ;;  %2412 = verf.f32 %v709_v15  ;;  %v2702_v30 = vmul.f32 0.5, %v2296_v54 }
  0xf1   : > { %v2397_v59 = vpop.eup %2396  ;;  %v624_v4 = vpop.f32.mrf.mxu0 }
  0xf2   : > { %v764_v0 = vmul.f32 %v744_v56, %v684_v55  ;;  %v743_v1 = vadd.f32 1.0, %v2397_v59  ;;  %v711_v23 = vmul.f32 0.70710677, %v624_v4  ;;  %2414 = verf.f32 %v712_v16 }
  0xf3   : > { %v2399_v5 = vpop.eup %2398  ;;  %v2299_v21 = vpop.f32.mrf.mxu0  ;;  %v2710_v38 = vmul.f32 0.5, %v624_v4 }
  0xf4   : > { %v805_v10 = vrot.slane %v764_v0, 7  ;;  %v763_v11 = vmul.f32 %v743_v1, %v683_v60  ;;  %v746_v12 = vadd.f32 1.0, %v2399_v5  ;;  %v714_v31 = vmul.f32 0.70710677, %v2299_v21 }
  0xf5   : > { %v2401_v13 = vpop.eup %2400  ;;  %v2706_v35 = vpop.f32.mrf.mxu0  ;;  %2416 = verf.f32 %v711_v23  ;;  %v2712_v50 = vmul.f32 0.5, %v2299_v21 }
  0xf6   : > { %v874_v17 = vsel %vm803_vm2, %v805_v10, 0.0  ;;  %v804_v18 = vrot.slane %v763_v11, 7  ;;  %v766_v19 = vmul.f32 %v746_v12, %v686_v2  ;;  %v745_v20 = vadd.f32 1.0, %v2401_v13 }
  0xf7   : > { %v913_v25 = vmul.f32 %v2667_v46, %v874_v17  ;;  %v1038_v29 = vmul.f32 %v2669_v47, %v874_v17  ;;  %v2403_v39 = vpop.eup %2402  ;;  %2418 = verf.f32 %v714_v31  ;;  %v2715_v54 = vmul.f32 0.5, %v2706_v35 }
  0xf8   : > { %v806_v26 = vsel %vm803_vm2, %v804_v18, %v805_v10  ;;  %v864_v27 = vsel %vm803_vm2, 0.0, %v804_v18  ;;  %v765_v28 = vmul.f32 %v745_v20, %v685_v3  ;;  %v808_v34 = vrot.slane %v766_v19, 7 }
  0xf9   : > { %v911_v32 = vmul.f32 %v2667_v46, %v864_v27  ;;  %v912_v33 = vmul.f32 %v2667_v46, %v806_v26  ;;  %v1036_v36 = vmul.f32 %v2669_v47, %v864_v27  ;;  %v1037_v37 = vmul.f32 %v2669_v47, %v806_v26  ;;  %v2405_v44 = vpop.eup %2404 }
  0xfa   : > { %v963_v40 = vrot.slane %v913_v25, 1  ;;  %v807_v43 = vrot.slane %v765_v28, 7  ;;  %v1088_v45 = vrot.slane %v1038_v29, 2  ;;  %v891_v55 = vmul.f32 %v2671_v48, %v864_v27  ;;  %v2724_v5 = vpop.eup %2406 }
  0xfb   : > { %v960_v41 = vrot.slane %v911_v32, 1  ;;  %v961_v42 = vrot.slane %v912_v33, 1  ;;  %v875_v58 = vsel %vm803_vm2, %v808_v34, 0.0  ;;  %v892_v59 = vmul.f32 %v2671_v48, %v806_v26  ;;  %v2409_v13 = vpop.eup %2408 }
  0xfc   : > { %v1085_v60 = vrot.slane %v1036_v36, 2  ;;  %v1086_v62 = vrot.slane %v1037_v37, 2  ;;  %v748_v0 = vadd.f32 1.0, %v2403_v39  ;;  %v809_v2 = vsel %vm803_vm2, %v807_v43, %v808_v34  ;;  %v2737_v25 = vpop.eup %2410 }
  0xfd   : > { %v962_v56 = vsel %vm959_vm3, %v960_v41, %v961_v42  ;;  %v964_v57 = vsel %vm959_vm3, %v961_v42, %v963_v40  ;;  %v865_v3 = vsel %vm803_vm2, 0.0, %v807_v43  ;;  %v747_v4 = vadd.f32 1.0, %v2405_v44  ;;  %v2413_v36 = vpop.eup %2412 }
  0xfe   : > { %v1016_v1 = vadd.f32 %v962_v56, %v891_v55  ;;  %v1017_v9 = vadd.f32 %v964_v57, %v892_v59  ;;  %v916_v10 = vmul.f32 %v2667_v46, %v875_v58  ;;  %v1041_v11 = vmul.f32 %v2669_v47, %v875_v58 }
  0xff   : > { %v1199_v12 = vmul.f32 %v2673_v49, %v875_v58  ;;  %v914_v15 = vmul.f32 %v2667_v46, %v865_v3  ;;  %v915_v16 = vmul.f32 %v2667_v46, %v809_v2  ;;  %v1039_v17 = vmul.f32 %v2669_v47, %v865_v3  ;;  %v2415_v42 = vpop.eup %2414 }
 0x100   : > { %v1040_v18 = vmul.f32 %v2669_v47, %v809_v2  ;;  %v1087_v19 = vsel %vm1084_vm4, %v1085_v60, %v1086_v62  ;;  %v1323_v20 = vmul.f32 %v2675_v51, %v875_v58  ;;  %v1197_v21 = vmul.f32 %v2673_v49, %v865_v3 }
 0x101   : > { %v1198_v23 = vmul.f32 %v2673_v49, %v809_v2  ;;  %v1089_v26 = vsel %vm1084_vm4, %v1086_v62, %v1088_v45  ;;  %v1141_v27 = vadd.f32 %v1087_v19, %v1016_v1  ;;  %v965_v28 = vrot.slane %v914_v15, 1 }
 0x102   : > { %v966_v29 = vrot.slane %v915_v16, 1  ;;  %v1142_v31 = vadd.f32 %v1089_v26, %v1017_v9  ;;  %v968_v32 = vrot.slane %v916_v10, 1  ;;  %v1093_v33 = vrot.slane %v1041_v11, 2  ;;  %v2417_v56 = vpop.eup %2416 }
 0x103   : > { %v1248_v34 = vrot.slane %v1199_v12, 1  ;;  %v1090_v37 = vrot.slane %v1039_v17, 2  ;;  %v1091_v39 = vrot.slane %v1040_v18, 2  ;;  %v1161_v40 = vmul.f32 %v2677_v52, %v865_v3 }
 0x104   : > { %v1162_v41 = vmul.f32 %v2677_v52, %v809_v2  ;;  %v967_v43 = vsel %vm959_vm3, %v965_v28, %v966_v29  ;;  %v969_v44 = vsel %vm959_vm3, %v966_v29, %v968_v32  ;;  %v1245_v45 = vrot.slane %v1197_v21, 1  ;;  %v2419_v11 = vpop.eup %2418 }
 0x105   : > { %v1246_v55 = vrot.slane %v1198_v23, 1  ;;  %v1372_v57 = vrot.slane %v1323_v20, 2  ;;  %v893_v58 = vmul.f32 %v2671_v48, %v865_v3  ;;  %v894_v59 = vmul.f32 %v2671_v48, %v809_v2 }
 0x106   : > { %v1177_v60 = vadd.f32 %v1161_v40, %v1141_v27  ;;  %v1178_v62 = vadd.f32 %v1162_v41, %v1142_v31  ;;  %v2747_v1 = vmul.f32 %v2675_v51, %v809_v2  ;;  %v768_v9 = vmul.f32 %v748_v0, %v2685_v6 }
 0x107   : > { %v767_v10 = vmul.f32 %v747_v4, %v2687_v7  ;;  %v1018_v12 = vadd.f32 %v967_v43, %v893_v58  ;;  %v1019_v15 = vadd.f32 %v969_v44, %v894_v59  ;;  %v750_v16 = vadd.f32 1.0, %v2409_v13 }
 0x108   : > { %v749_v17 = vadd.f32 1.0, %v2413_v36  ;;  %v1092_v18 = vsel %vm1084_vm4, %v1090_v37, %v1091_v39  ;;  %v1247_v19 = vsel %vm959_vm3, %v1245_v45, %v1246_v55  ;;  %v811_v20 = vrot.slane %v768_v9, 7 }
 0x109   : > { %v810_v21 = vrot.slane %v767_v10, 7  ;;  %v1094_v23 = vsel %vm1084_vm4, %v1091_v39, %v1093_v33  ;;  %v1249_v2 = vsel %vm959_vm3, %v1246_v55, %v1248_v34  ;;  %v2755_v26 = vadd.f32 %v1247_v19, %v1177_v60 }
 0x10a   : > { %v2758_v6 = vmul.f32 %v2675_v51, %v865_v3  ;;  %v2760_v7 = vadd.f32 %v1249_v2, %v1178_v62  ;;  %v3763_v0 = vrot.slane %v2747_v1, 2  ;;  %v876_v4 = vsel %vm803_vm2, %v811_v20, 0.0 }
 0x10b   : > { %v752_v13 = vadd.f32 1.0, %v2415_v42  ;;  %v2764_v27 = vadd.f32 %v1092_v18, %v1018_v12  ;;  %v2766_v28 = vadd.f32 %v1094_v23, %v1019_v15  ;;  %v770_v29 = vmul.f32 %v750_v16, %v2691_v14  ;;  %v2824_v16 = vpop.f32.mrf.mxu0 }
 0x10c   : > { %v769_v31 = vmul.f32 %v749_v17, %v2694_v22  ;;  %v2771_v32 = vmul.f32 %v2667_v46, %v876_v4  ;;  %v2774_v3 = vmul.f32 %v2669_v47, %v876_v4  ;;  %v2777_v33 = vmul.f32 %v2673_v49, %v876_v4 }
 0x10d   : > { %v2780_v34 = vsel %vm803_vm2, 0.0, %v810_v21  ;;  %v2784_v37 = vmul.f32 %v2675_v51, %v876_v4  ;;  %v2787_v14 = vmul.f32 %v2679_v53, %v876_v4  ;;  %v751_v22 = vadd.f32 1.0, %v2417_v56 }
 0x10e   : > { %v2792_v39 = vsel %vm1084_vm4, %v3763_v0, %v1372_v57  ;;  %v2795_v40 = vmul.f32 %v2681_v61, %v876_v4  ;;  %v2798_v41 = vsel %vm803_vm2, %v810_v21, %v811_v20  ;;  %v772_v42 = vmul.f32 %v752_v13, %v2702_v30  ;;  %v2869_v57 = vpop.f32.mrf.mxu0 }
 0x10f   : > { %v2803_v43 = vmul.f32 %v2667_v46, %v2780_v34  ;;  %v814_v44 = vrot.slane %v770_v29, 7  ;;  %v813_v45 = vrot.slane %v769_v31, 7  ;;  %v754_v55 = vadd.f32 1.0, %v2419_v11 }
 0x110   : > { %v2810_v59 = vmul.f32 %v2671_v48, %v2780_v34  ;;  %v2816_v62 = vmul.f32 %v2667_v46, %v2798_v41  ;;  %v817_v12 = vrot.slane %v772_v42, 7  ;;  %v771_v15 = vmul.f32 %v751_v22, %v2710_v38  ;;  %v2904_v56 = vpop.f32.mrf.mxu0 }
 0x111   : > { %v877_v9 = vsel %vm803_vm2, %v814_v44, 0.0  ;;  %v2821_v11 = vsel %vm803_vm2, 0.0, %v813_v45  ;;  %v2829_v18 = vmul.f32 %v2669_v47, %v2780_v34  ;;  %v2835_v20 = vsel %vm803_vm2, %v813_v45, %v814_v44 }
 0x112   : > { %v2832_v19 = vmul.f32 %v2667_v46, %v877_v9  ;;  %v2838_v21 = vmul.f32 %v2669_v47, %v877_v9  ;;  %v2841_v23 = vmul.f32 %v2673_v49, %v877_v9  ;;  %v2844_v38 = vmul.f32 %v2675_v51, %v877_v9 }
 0x113   : > { %v2847_v2 = vmul.f32 %v2679_v53, %v877_v9  ;;  %v2852_v13 = vmul.f32 %v2669_v47, %v2798_v41  ;;  %v2855_v29 = vmul.f32 %v2681_v61, %v877_v9  ;;  %v2859_v31 = vmul.f32 %v2667_v46, %v2821_v11 }
 0x114   : > { %3821 = vst [vmem:[#allocation2_spill] sm:$0xff] %v2832_v19  ;;  %3822 = vst [vmem:[#allocation3_spill] sm:$0xff] %v2838_v21  ;;  %v2863_v22 = vmul.f32 %v2667_v46, %v2835_v20  ;;  %v878_v42 = vsel %vm803_vm2, %v817_v12, 0.0  ;;  %v816_v44 = vrot.slane %v771_v15, 7  ;;  %v2867_v45 = vmul.f32 %v754_v55, %v2712_v50 }
 0x115   : > { %3823 = vst [vmem:[#allocation4_spill] sm:$0xff] %v2841_v23  ;;  %3824 = vst [vmem:[#allocation5_spill] sm:$0xff] %v2844_v38  ;;  %v2875_v17 = vmul.f32 %v2671_v48, %v2821_v11  ;;  %v2879_v4 = vmul.f32 %v2669_v47, %v2821_v11  ;;  %v2889_v58 = vmul.f32 %v2669_v47, %v2835_v20  ;;  %v762_v21 = vadd.f32 1.0, %v2724_v5 }
 0x116   : > { %3825 = vst [vmem:[#allocation6_spill] sm:$0xff] %v2859_v31  ;;  %3826 = vst [vmem:[#allocation7_spill] sm:$0xff] %v2863_v22  ;;  %v2892_v10 = vmul.f32 %v2667_v46, %v878_v42  ;;  %v2896_v60 = vmul.f32 %v2669_v47, %v878_v42  ;;  %v2899_v50 = vsel %vm803_vm2, %v816_v44, %v817_v12  ;;  %v2902_v15 = vsel %vm803_vm2, 0.0, %v816_v44 }
 0x117   : > { %3827 = vst [vmem:[#allocation8_spill] sm:$0xff] %v2875_v17  ;;  %3828 = vst [vmem:[#allocation9_spill] sm:$0xff] %v2879_v4  ;;  %v2908_v55 = vmul.f32 %v2673_v49, %v878_v42  ;;  %v2911_v36 = vmul.f32 %v2675_v51, %v878_v42  ;;  %v2914_v30 = vmul.f32 %v2679_v53, %v878_v42  ;;  %v3773_v12 = vrot.slane %v2867_v45, 7 }
 0x118   : > { %3829 = vst [vmem:[#allocation10_spill] sm:$0xff] %v2889_v58  ;;  %3830 = vst [vmem:[#allocation11_spill] sm:$0xff] %v2892_v10  ;;  %v2917_v0 = vmul.f32 %v2681_v61, %v878_v42  ;;  %v713_v44 = vmul.f32 0.70710677, %v2706_v35  ;;  %v2925_v19 = vmul.f32 %v2667_v46, %v2902_v15  ;;  %v2929_v4 = vmul.f32 %v2667_v46, %v2899_v50  ;;  %v654_v10 = vpop.f32.mrf.mxu0 }
 0x119   : > { %3831 = vst [vmem:[#allocation12_spill] sm:$0xff] %v2896_v60  ;;  %3832 = vst [vmem:[#allocation13_spill] sm:$0xff] %v2908_v55  ;;  %v2933_v42 = vmul.f32 %v2669_v47, %v2902_v15  ;;  %v879_v35 = vsel %vm803_vm2, %v3773_v12, 0.0  ;;  %v782_v5 = vmul.f32 %v762_v21, %v2689_v8  ;;  %v716_v9 = vmul.f32 0.70710677, %v2824_v16 }
 0x11a   : > { %3833 = vst [vmem:[#allocation14_spill] sm:$0xff] %v2911_v36  ;;  %3834 = vst [vmem:[#allocation15_spill] sm:$0xff] %v2914_v30  ;;  %2420 = verf.f32 %v713_v44  ;;  %v2947_v23 = vmul.f32 %v2671_v48, %v2902_v15  ;;  %v2952_v21 = vmul.f32 %v2669_v47, %v2899_v50  ;;  %v2955_v17 = vmul.f32 %v2667_v46, %v879_v35 }
 0x11b   : > { %3835 = vst [vmem:[#allocation16_spill] sm:$0xff] %v2917_v0  ;;  %3836 = vst [vmem:[#allocation17_spill] sm:$0xff] %v2925_v19  ;;  %v832_v44 = vrot.slane %v782_v5, 7  ;;  %2422 = verf.f32 %v716_v9  ;;  %v2958_v31 = vmul.f32 %v2669_v47, %v879_v35  ;;  %v2963_v22 = vmul.f32 %v2673_v49, %v879_v35  ;;  %v2308_v5 = vpop.f32.mrf.mxu0 }
 0x11c   : > { %3837 = vst [vmem:[#allocation18_spill] sm:$0xff] %v2929_v4  ;;  %3838 = vst [vmem:[#allocation19_spill] sm:$0xff] %v2933_v42  ;;  %v761_v9 = vadd.f32 1.0, %v2737_v25  ;;  %v2967_v8 = vmul.f32 %v2675_v51, %v879_v35  ;;  %v2970_v12 = vmul.f32 %v2679_v53, %v879_v35  ;;  %v2975_v58 = vmul.f32 %v2681_v61, %v879_v35 }
 0x11d   : > { %3839 = vst [vmem:[#allocation20_spill] sm:$0xff] %v2947_v23  ;;  %3840 = vst [vmem:[#allocation21_spill] sm:$0xff] %v2952_v21  ;;  %v883_v60 = vsel %vm803_vm2, %v832_v44, 0.0  ;;  %v715_v23 = vmul.f32 0.70710677, %v2869_v57  ;;  %v696_v38 = vmul.f32 0.5, %v2824_v16  ;;  %v664_v0 = vpop.f32.mrf.mxu0 }
 0x11e   : > { %3841 = vst [vmem:[#allocation22_spill] sm:$0xff] %v2955_v17  ;;  %3842 = vst [vmem:[#allocation23_spill] sm:$0xff] %v2958_v31  ;;  %v781_v42 = vmul.f32 %v761_v9, %v2696_v24  ;;  %v718_v25 = vmul.f32 0.70710677, %v2904_v56  ;;  %v717_v4 = vmul.f32 0.70710677, %v654_v10  ;;  %v2983_v36 = vmul.f32 %v2679_v53, %v883_v60 }
 0x11f   : > { %3843 = vst [vmem:[#allocation24_spill] sm:$0xff] %v2963_v22  ;;  %3844 = vst [vmem:[#allocation25_spill] sm:$0xff] %v2967_v8  ;;  %2424 = verf.f32 %v715_v23  ;;  %v2986_v55 = vmul.f32 %v2681_v61, %v883_v60  ;;  %v720_v21 = vmul.f32 0.70710677, %v2308_v5  ;;  %v2995_v17 = vmul.f32 0.5, %v2869_v57 }
 0x120   : > { %3845 = vst [vmem:[#allocation26_spill] sm:$0xff] %v2970_v12  ;;  %3846 = vst [vmem:[#allocation27_spill] sm:$0xff] %v2975_v58  ;;  %v831_v35 = vrot.slane %v781_v42, 7  ;;  %2426 = verf.f32 %v718_v25  ;;  %v719_v25 = vmul.f32 0.70710677, %v664_v0  ;;  %v698_v19 = vmul.f32 0.5, %v2904_v56 }
 0x121   : > { %3847 = vst [vmem:[#allocation28_spill] sm:$0xff] %v2983_v36  ;;  %3848 = vst [vmem:[#allocation29_spill] sm:$0xff] %v2986_v55  ;;  %2428 = verf.f32 %v717_v4  ;;  %v3004_v9 = vmul.f32 0.5, %v654_v10  ;;  %v3850_v57 = vrot.slane %v2747_v1, 2  ;;  %v1481_v4 = vmul.f32 %v2679_v53, %v2780_v34 }
 0x122   : > { %v833_v23 = vsel %vm803_vm2, %v831_v35, %v832_v44  ;;  %v873_v31 = vsel %vm803_vm2, 0.0, %v831_v35  ;;  %2430 = verf.f32 %v720_v21  ;;  %v3851_v35 = vrot.slane %v2758_v6, 2 }
 0x123   : > { %v1502_v60 = vmul.f32 %v2679_v53, %v873_v31  ;;  %v2999_v42 = vmul.f32 %v2679_v53, %v833_v23  ;;  %v1482_v24 = vmul.f32 %v2679_v53, %v2798_v41  ;;  %v3016_v16 = vmul.f32 %v2681_v61, %v873_v31 }
 0x124   : > { %v1371_v8 = vsel %vm1084_vm4, %v3851_v35, %v3850_v57  ;;  %v3019_v56 = vmul.f32 %v2681_v61, %v833_v23  ;;  %2432 = verf.f32 %v719_v25  ;;  %v1529_v57 = vrot.slane %v1481_v4, 1 }
 0x125   : > { %3849 = vst [vmem:[#allocation30_spill] sm:$0xff] %v2999_v42  ;;  %3852 = vst [vmem:[#allocation31_spill] sm:$0xff] %v3016_v16  ;;  %v1425_v10 = vadd.f32 %v1371_v8, %v2755_v26  ;;  %v1564_v21 = vrot.slane %v1502_v60, 1  ;;  %v3791_v6 = vrot.slane %v2999_v42, 1  ;;  %v1530_v22 = vrot.slane %v1482_v24, 1 }
 0x126   : > { %3853 = vst [vmem:[#allocation32_spill] sm:$0xff] %v3019_v56  ;;  %v3027_v58 = vmul.f32 %v2683_v63, %v873_v31  ;;  %v3029_v12 = vmul.f32 0.5, %v2308_v5  ;;  %v3031_v30 = vmul.f32 0.5, %v664_v0  ;;  %v1445_v26 = vmul.f32 %v2683_v63, %v2780_v34 }
 0x127   : > { %v2421_v44 = vpop.eup %2420  ;;  %v3036_v25 = vmul.f32 %v2683_v63, %v833_v23  ;;  %v1426_v0 = vadd.f32 %v2792_v39, %v2760_v7  ;;  %v1446_v7 = vmul.f32 %v2683_v63, %v2798_v41  ;;  %v3860_v39 = vrot.slane %v2787_v14, 1 }
 0x128   : > { %v753_v36 = vadd.f32 1.0, %v2421_v44  ;;  %v2423_v1 = vpop.eup %2422  ;;  %v1605_v44 = vmul.f32 %v2681_v61, %v2780_v34  ;;  %3854 = vst [vmem:[#allocation33_spill] sm:$0xff] %v3027_v58  ;;  %v1461_v5 = vadd.f32 %v1445_v26, %v1425_v10 }
 0x129   : > { %v756_v55 = vadd.f32 1.0, %v2423_v1  ;;  %3855 = vst [vmem:[#allocation34_spill] sm:$0xff] %v3036_v25 }
 0x12a   : > { %v773_v35 = vmul.f32 %v753_v36, %v2715_v54  ;;  %v3040_v54 = vmul.f32 %v2681_v61, %v2798_v41  ;;  %v1653_v23 = vrot.slane %v1605_v44, 2 }
 0x12b   : > { %v776_v60 = vmul.f32 %v756_v55, %v696_v38  ;;  %v3049_v38 = vsel %vm959_vm3, %v1564_v21, %v3791_v6  ;;  %v1531_v55 = vsel %vm959_vm3, %v1529_v57, %v1530_v22  ;;  %v1533_v21 = vsel %vm959_vm3, %v1530_v22, %v3860_v39 }
 0x12c   : > { %v819_v8 = vrot.slane %v773_v35, 7  ;;  %v2425_v24 = vpop.eup %2424  ;;  %3856 = vst [vmem:[#allocation35_spill] sm:$0xff] %v3049_v38  ;;  %v3857_v35 = vrot.slane %v2867_v45, 7  ;;  %v1585_v45 = vadd.f32 %v1531_v55, %v1461_v5  ;;  %v1462_v6 = vadd.f32 %v1446_v7, %v1426_v0 }
 0x12d   : > { %v823_v4 = vrot.slane %v776_v60, 7  ;;  %v2427_v1 = vpop.eup %2426  ;;  %v755_v57 = vadd.f32 1.0, %v2425_v24  ;;  %v3089_v0 = vmul.f32 %v2673_v49, %v2798_v41  ;;  %v3866_v16 = vrot.slane %v3040_v54, 2 }
 0x12e   : > { %v3055_v36 = vsel %vm803_vm2, %v819_v8, %v3857_v35  ;;  %v3058_v10 = vsel %vm803_vm2, 0.0, %v819_v8  ;;  %v758_v44 = vadd.f32 1.0, %v2427_v1  ;;  %v3069_v35 = vmul.f32 %v2677_v52, %v2780_v34  ;;  %v2429_v31 = vpop.eup %2428 }
 0x12f   : > { %3858 = vst [vmem:[#allocation36_spill] sm:$0xff] %v3055_v36  ;;  %3859 = vst [vmem:[#allocation37_spill] sm:$0xff] %v3058_v10  ;;  %v880_v26 = vsel %vm803_vm2, %v823_v4, 0.0  ;;  %v3073_v8 = vmul.f32 %v2673_v49, %v2780_v34  ;;  %v3077_v14 = vmul.f32 %v2667_v46, %v3058_v10  ;;  %v3081_v22 = vmul.f32 %v2667_v46, %v3055_v36  ;;  %v2431_v39 = vpop.eup %2430 }
 0x130   : > { %v3085_v5 = vmul.f32 %v2669_v47, %v3058_v10  ;;  %v3092_v24 = vmul.f32 %v2667_v46, %v880_v26  ;;  %v3095_v55 = vmul.f32 %v2669_v47, %v880_v26  ;;  %v775_v1 = vmul.f32 %v755_v57, %v2995_v17 }
 0x131   : > { %v778_v7 = vmul.f32 %v758_v44, %v698_v19  ;;  %v3100_v60 = vmul.f32 %v2671_v48, %v3058_v10  ;;  %v3104_v42 = vmul.f32 %v2669_v47, %v3055_v36  ;;  %v3107_v25 = vmul.f32 %v2673_v49, %v880_v26  ;;  %v2433_v44 = vpop.eup %2432 }
 0x132   : > { %3861 = vst [vmem:[#allocation38_spill] sm:$0xff] %v3092_v24  ;;  %3862 = vst [vmem:[#allocation39_spill] sm:$0xff] %v3095_v55  ;;  %v1655_v56 = vsel %vm1084_vm4, %v1653_v23, %v3866_v16  ;;  %v3113_v38 = vmul.f32 %v2675_v51, %v880_v26  ;;  %v822_v17 = vrot.slane %v775_v1, 7  ;;  %v757_v57 = vadd.f32 1.0, %v2429_v31 }
 0x133   : > { %3863 = vst [vmem:[#allocation40_spill] sm:$0xff] %v3100_v60  ;;  %3864 = vst [vmem:[#allocation41_spill] sm:$0xff] %v3104_v42  ;;  %v826_v19 = vrot.slane %v778_v7, 7  ;;  %v3118_v42 = vmul.f32 %v2679_v53, %v880_v26  ;;  %v3121_v36 = vmul.f32 %v2681_v61, %v880_v26  ;;  %v760_v60 = vadd.f32 1.0, %v2431_v39 }
 0x134   : > { %3865 = vst [vmem:[#allocation42_spill] sm:$0xff] %v3107_v25  ;;  %3867 = vst [vmem:[#allocation43_spill] sm:$0xff] %v3113_v38  ;;  %v3127_v1 = vsel %vm803_vm2, 0.0, %v822_v17  ;;  %v3131_v7 = vsel %vm803_vm2, %v822_v17, %v823_v4  ;;  %v777_v58 = vmul.f32 %v757_v57, %v3004_v9  ;;  %v759_v23 = vadd.f32 1.0, %v2433_v44 }
 0x135   : > { %3868 = vst [vmem:[#allocation44_spill] sm:$0xff] %v3121_v36  ;;  %v3137_v10 = vmul.f32 %v2667_v46, %v3127_v1  ;;  %v881_v16 = vsel %vm803_vm2, %v826_v19, 0.0  ;;  %v1709_v31 = vadd.f32 %v1655_v56, %v1585_v45  ;;  %v3142_v25 = vadd.f32 %v1533_v21, %v1462_v6 }
 0x136   : > { %v3146_v9 = vmul.f32 %v2671_v48, %v3127_v1  ;;  %v3150_v4 = vmul.f32 %v2667_v46, %v3131_v7  ;;  %v3154_v39 = vmul.f32 %v2669_v47, %v3127_v1  ;;  %v3158_v17 = vmul.f32 %v2669_v47, %v3131_v7 }
 0x137   : > { %3869 = vst [vmem:[#allocation45_spill] sm:$0xff] %v3137_v10  ;;  %v934_v56 = vmul.f32 %v2667_v46, %v881_v16  ;;  %v1059_v6 = vmul.f32 %v2669_v47, %v881_v16  ;;  %v825_v21 = vrot.slane %v777_v58, 7  ;;  %v780_v45 = vmul.f32 %v760_v60, %v3029_v12 }
 0x138   : > { %3870 = vst [vmem:[#allocation46_spill] sm:$0xff] %v3146_v9  ;;  %3871 = vst [vmem:[#allocation47_spill] sm:$0xff] %v3150_v4  ;;  %v3165_v44 = vmul.f32 %v2673_v49, %v881_v16  ;;  %v3168_v26 = vmul.f32 %v2675_v51, %v881_v16  ;;  %v779_v24 = vmul.f32 %v759_v23, %v3031_v30 }
 0x139   : > { %3872 = vst [vmem:[#allocation48_spill] sm:$0xff] %v3154_v39  ;;  %3873 = vst [vmem:[#allocation49_spill] sm:$0xff] %v3158_v17  ;;  %v3172_v55 = vmul.f32 %v2679_v53, %v881_v16  ;;  %v3175_v9 = vsel %vm803_vm2, %v825_v21, %v826_v19  ;;  %v3178_v58 = vsel %vm803_vm2, 0.0, %v825_v21  ;;  %v829_v12 = vrot.slane %v780_v45, 7 }
 0x13a   : > { %3874 = vst [vmem:[#allocation50_spill] sm:$0xff] %v3165_v44  ;;  %3875 = vst [vmem:[#allocation51_spill] sm:$0xff] %v3168_v26  ;;  %v828_v17 = vrot.slane %v779_v24, 7  ;;  %v932_v10 = vmul.f32 %v2667_v46, %v3178_v58  ;;  %v998_v38 = vrot.slane %v934_v56, 1  ;;  %v933_v30 = vmul.f32 %v2667_v46, %v3175_v9 }
 0x13b   : > { %3876 = vst [vmem:[#allocation52_spill] sm:$0xff] %v3172_v55  ;;  %3877 = vst [vmem:[#allocation53_spill] sm:$0xff] %v3175_v9  ;;  %v1057_v19 = vmul.f32 %v2669_v47, %v3178_v58  ;;  %v1058_v23 = vmul.f32 %v2669_v47, %v3175_v9  ;;  %v1123_v21 = vrot.slane %v1059_v6, 2  ;;  %v3193_v24 = vmul.f32 %v2681_v61, %v881_v16 }
 0x13c   : > { %3878 = vst [vmem:[#allocation54_spill] sm:$0xff] %v3178_v58  ;;  %v3197_v56 = vsel %vm803_vm2, %v829_v12, 0.0  ;;  %v995_v46 = vrot.slane %v932_v10, 1  ;;  %v996_v39 = vrot.slane %v933_v30, 1  ;;  %v3200_v4 = vsel %vm803_vm2, %v828_v17, %v829_v12 }
 0x13d   : > { %3879 = vst [vmem:[#allocation55_spill] sm:$0xff] %v3197_v56  ;;  %v872_v47 = vsel %vm803_vm2, 0.0, %v828_v17  ;;  %v905_v6 = vmul.f32 %v2671_v48, %v3178_v58  ;;  %v906_v60 = vmul.f32 %v2671_v48, %v3175_v9  ;;  %v1120_v57 = vrot.slane %v1057_v19, 2 }
 0x13e   : > { %v997_v16 = vsel %vm959_vm3, %v995_v46, %v996_v39  ;;  %v999_v45 = vsel %vm959_vm3, %v996_v39, %v998_v38  ;;  %v1121_v26 = vrot.slane %v1058_v23, 2  ;;  %v3211_v10 = vmul.f32 %v2673_v49, %v3197_v56 }
 0x13f   : > { %v3215_v12 = vmul.f32 %v2675_v51, %v3197_v56  ;;  %v1030_v17 = vadd.f32 %v997_v16, %v905_v6  ;;  %v3217_v30 = vmul.f32 0.5, %v1709_v31  ;;  %v1031_v44 = vadd.f32 %v999_v45, %v906_v60 }
 0x140   : > { %3880 = vst [vmem:[#allocation56_spill] sm:$0xff] %v3211_v10  ;;  %v1122_v55 = vsel %vm1084_vm4, %v1120_v57, %v1121_v26  ;;  %v1218_v46 = vmul.f32 %v2673_v49, %v872_v47  ;;  %v3223_v38 = vmul.f32 %v2673_v49, %v3200_v4  ;;  %v3226_v19 = vmul.f32 %v2675_v51, %v872_v47 }
 0x141   : > { %3881 = vst [vmem:[#allocation57_spill] sm:$0xff] %v3215_v12  ;;  %v1155_v39 = vadd.f32 %v1122_v55, %v1030_v17  ;;  %v3230_v23 = vmul.f32 %v2675_v51, %v3200_v4  ;;  %v1741_v6 = vmul.f32 0.70710677, %v1709_v31  ;;  %v1175_v60 = vmul.f32 %v2677_v52, %v872_v47 }
 0x142   : > { %3882 = vst [vmem:[#allocation58_spill] sm:$0xff] %v3223_v38  ;;  %v1280_v57 = vrot.slane %v1218_v46, 1  ;;  %v3239_v55 = vmul.f32 %v2679_v53, %v3197_v56  ;;  %v1124_v17 = vsel %vm1084_vm4, %v1121_v26, %v1123_v21  ;;  %v3246_v31 = vmul.f32 %v2677_v52, %v3200_v4 }
 0x143   : > { %v3242_v36 = vadd.f32 %v1124_v17, %v1031_v44  ;;  %v1191_v16 = vadd.f32 %v1175_v60, %v1155_v39  ;;  %v3249_v46 = vmul.f32 %v2683_v63, %v872_v47  ;;  %2434 = verf.f32 %v1741_v6 }
 0x144   : > { %3883 = vst [vmem:[#allocation59_spill] sm:$0xff] %v3239_v55  ;;  %v3884_v45 = vrot.slane %v2795_v40, 2  ;;  %v3885_v55 = vrot.slane %v3040_v54, 2  ;;  %v3886_v44 = vrot.slane %v3223_v38, 1  ;;  %v3262_v39 = vmul.f32 %v2679_v53, %v872_v47 }
 0x145   : > { %v3266_v60 = vmul.f32 %v2679_v53, %v3200_v4  ;;  %v1179_v40 = vadd.f32 %v3069_v35, %v2764_v27  ;;  %v1250_v54 = vrot.slane %v3073_v8, 1  ;;  %v1251_v6 = vrot.slane %v3089_v0, 1 }
 0x146   : > { %v1657_v26 = vsel %vm1084_vm4, %v3885_v55, %v3884_v45  ;;  %v1282_v21 = vsel %vm959_vm3, %v1280_v57, %v3886_v44  ;;  %v1324_v45 = vmul.f32 %v2675_v51, %v2780_v34  ;;  %v3278_v55 = vmul.f32 %v2681_v61, %v872_v47 }
 0x147   : > { %v1710_v17 = vadd.f32 %v1657_v26, %v3142_v25  ;;  %v3275_v57 = vadd.f32 %v1282_v21, %v1191_v16  ;;  %v1325_v9 = vmul.f32 %v2675_v51, %v2798_v41  ;;  %v1252_v25 = vsel %vm959_vm3, %v1250_v54, %v1251_v6 }
 0x148   : > { %v1374_v26 = vrot.slane %v1324_v45, 2  ;;  %v1484_v27 = vmul.f32 %v2679_v53, %v2821_v11  ;;  %v1485_v35 = vmul.f32 %v2679_v53, %v2835_v20  ;;  %v1303_v34 = vadd.f32 %v1252_v25, %v1179_v40 }
 0x149   : > { %v1742_v44 = vmul.f32 0.70710677, %v1710_v17  ;;  %v1375_v8 = vrot.slane %v1325_v9, 2  ;;  %v1608_v0 = vmul.f32 %v2681_v61, %v2821_v11  ;;  %v1609_v21 = vmul.f32 %v2681_v61, %v2835_v20 }
 0x14a   : > { %v1534_v47 = vrot.slane %v1484_v27, 1  ;;  %v1535_v16 = vrot.slane %v1485_v35, 1  ;;  %v1164_v54 = vmul.f32 %v2677_v52, %v2798_v41  ;;  %v1726_v45 = vmul.f32 0.5, %v1710_v17 }
 0x14b   : > { %2436 = verf.f32 %v1742_v44  ;;  %v1376_v58 = vsel %vm1084_vm4, %v1374_v26, %v1375_v8  ;;  %v1447_v44 = vmul.f32 %v2683_v63, %v2821_v11  ;;  %v1658_v40 = vrot.slane %v1608_v0, 2 }
 0x14c   : > { %v1427_v9 = vadd.f32 %v1376_v58, %v1303_v34  ;;  %v1659_v25 = vrot.slane %v1609_v21, 2  ;;  %v1180_v56 = vadd.f32 %v1164_v54, %v2766_v28  ;;  %v3887_v27 = vrot.slane %v2777_v33, 1 }
 0x14d   : > { %v1536_v12 = vsel %vm959_vm3, %v1534_v47, %v1535_v16  ;;  %v3888_v38 = vrot.slane %v2784_v37, 2  ;;  %v3889_v26 = vrot.slane %v2816_v62, 1  ;;  %v3890_v10 = vrot.slane %v2803_v43, 1 }
 0x14e   : > { %v1254_v35 = vsel %vm959_vm3, %v1251_v6, %v3887_v27  ;;  %v1096_v58 = vrot.slane %v2852_v13, 2  ;;  %v1463_v34 = vadd.f32 %v1447_v44, %v1427_v9  ;;  %v1448_v33 = vmul.f32 %v2683_v63, %v2835_v20 }
 0x14f   : > { %v1378_v17 = vsel %vm1084_vm4, %v1375_v8, %v3888_v38  ;;  %v972_v0 = vsel %vm959_vm3, %v3890_v10, %v3889_v26  ;;  %v1304_v28 = vadd.f32 %v1254_v35, %v1180_v56  ;;  %v3891_v6 = vrot.slane %v2847_v2, 1 }
 0x150   : > { %v1660_v37 = vsel %vm1084_vm4, %v1658_v40, %v1659_v25  ;;  %v1020_v38 = vadd.f32 %v972_v0, %v2810_v59  ;;  %v3892_v8 = vrot.slane %v2829_v18, 2  ;;  %v1203_v13 = vmul.f32 %v2673_v49, %v2821_v11 }
 0x151   : > { %v1538_v47 = vsel %vm959_vm3, %v1535_v16, %v3891_v6  ;;  %v1587_v10 = vadd.f32 %v1536_v12, %v1463_v34  ;;  %v1428_v56 = vadd.f32 %v1378_v17, %v1304_v28  ;;  %v1204_v21 = vmul.f32 %v2673_v49, %v2835_v20  ;;  %v2435_v16 = vpop.eup %2434 }
 0x152   : > { %v1097_v43 = vsel %vm1084_vm4, %v3892_v8, %v1096_v58  ;;  %v1327_v2 = vmul.f32 %v2675_v51, %v2821_v11  ;;  %v1165_v59 = vmul.f32 %v2677_v52, %v2821_v11  ;;  %v1255_v44 = vrot.slane %v1203_v13, 1 }
 0x153   : > { %v1145_v54 = vadd.f32 %v1097_v43, %v1020_v38  ;;  %v1328_v18 = vmul.f32 %v2675_v51, %v2835_v20  ;;  %v1773_v40 = vadd.f32 1.0, %v2435_v16  ;;  %v1711_v9 = vadd.f32 %v1660_v37, %v1587_v10 }
 0x154   : > { %v1464_v27 = vadd.f32 %v1448_v33, %v1428_v56  ;;  %v1256_v12 = vrot.slane %v1204_v21, 1  ;;  %v1379_v17 = vrot.slane %v1327_v2, 2  ;;  %v1487_v0 = vmul.f32 %v2679_v53, %v2902_v15 }
 0x155   : > { %v1181_v35 = vadd.f32 %v1165_v59, %v1145_v54  ;;  %v1380_v26 = vrot.slane %v1328_v18, 2  ;;  %v1789_v34 = vmul.f32 %v1773_v40, %v3217_v30  ;;  %v1743_v28 = vmul.f32 0.70710677, %v1711_v9 }
 0x156   : > { %v1588_v6 = vadd.f32 %v1538_v47, %v1464_v27  ;;  %v3893_v11 = vrot.slane %v2855_v29, 2  ;;  %v1257_v8 = vsel %vm959_vm3, %v1255_v44, %v1256_v12  ;;  %v1449_v33 = vmul.f32 %v2683_v63, %v2902_v15 }
 0x157   : > { %v1381_v37 = vsel %vm1084_vm4, %v1379_v17, %v1380_v26  ;;  %v1488_v43 = vmul.f32 %v2679_v53, %v2899_v50  ;;  %2316 = vmatprep.mubr.msk.f32.mxu1 %vm1807_vm5, %v1789_v34  ;;  %2438 = verf.f32 %v1743_v28  ;;  %v1305_v47 = vadd.f32 %v1257_v8, %v1181_v35  ;;  %v3897_v8 = vld [vmem:[#allocation4_spill] sm:$0xff] }
 0x158   : > { %v1662_v38 = vsel %vm1084_vm4, %v1659_v25, %v3893_v11  ;;  %v2437_v13 = vpop.eup %2436  ;;  %v1611_v29 = vmul.f32 %v2681_v61, %v2902_v15  ;;  %v1539_v10 = vrot.slane %v1487_v0, 1  ;;  %v3349_v21 = vmul.f32 %v2681_v61, %v2899_v50 }
 0x159   : > { %v3343_v30 = vadd.f32 %v1662_v38, %v1588_v6  ;;  %v1774_v25 = vadd.f32 1.0, %v2437_v13  ;;  %v1540_v56 = vrot.slane %v1488_v43, 1  ;;  %v1429_v16 = vadd.f32 %v1381_v37, %v1305_v47 }
 0x15a   : > { %v1663_v54 = vrot.slane %v1611_v29, 2  ;;  %v896_v59 = vmul.f32 %v2671_v48, %v2798_v41  ;;  %v3356_v44 = vmul.f32 %v2681_v61, %v3200_v4  ;;  %v1664_v40 = vrot.slane %v3349_v21, 2  ;;  %v3901_v29 = vld [vmem:[#allocation15_spill] sm:$0xff]  ;;  %v3905_v21 = vld [vmem:[#allocation6_spill] sm:$0xff] }
 0x15b   : > { %v1744_v2 = vmul.f32 0.70710677, %v3343_v30  ;;  %v1790_v18 = vmul.f32 %v1774_v25, %v1726_v45  ;;  %v3894_v27 = vrot.slane %v2771_v32, 1  ;;  %v3895_v35 = vrot.slane %v2816_v62, 1  ;;  %v3903_v25 = vld [vmem:[#allocation7_spill] sm:$0xff] }
 0x15c   : > { %v1727_v0 = vmul.f32 0.5, %v1711_v9  ;;  %v1465_v34 = vadd.f32 %v1449_v33, %v1429_v16  ;;  %v1541_v41 = vsel %vm959_vm3, %v1539_v10, %v1540_v56  ;;  %v1665_v6 = vsel %vm1084_vm4, %v1663_v54, %v1664_v40  ;;  %v3899_v33 = vld [vmem:[#allocation5_spill] sm:$0xff]  ;;  %v3907_v54 = vld [vmem:[#allocation10_spill] sm:$0xff] }
 0x15d   : > { %v974_v17 = vsel %vm959_vm3, %v3895_v35, %v3894_v27  ;;  %2440 = verf.f32 %v1744_v2  ;;  %2317 = vmatmul.mubr.msk.f32.vlgmr.msra.gmra.mxu1 %vm1807_vm5, %v1790_v18  ;;  %v3896_v45 = vrot.slane %v2774_v3, 2  ;;  %v1166_v32 = vmul.f32 %v2677_v52, %v2835_v20  ;;  %v3908_v27 = vld [vmem:[#allocation8_spill] sm:$0xff] }
 0x15e   : > { %v1021_v28 = vadd.f32 %v974_v17, %v896_v59  ;;  %v1589_v62 = vadd.f32 %v1541_v41, %v1465_v34  ;;  %v3898_v9 = vrot.slane %v3897_v8, 1  ;;  %v3900_v43 = vrot.slane %v3899_v33, 2  ;;  %v3909_v17 = vld [vmem:[#allocation9_spill] sm:$0xff] }
 0x15f   : > { %v1099_v11 = vsel %vm1084_vm4, %v1096_v58, %v3896_v45  ;;  %v1450_v47 = vmul.f32 %v2683_v63, %v2899_v50  ;;  %v3902_v3 = vrot.slane %v3901_v29, 1  ;;  %v3904_v10 = vrot.slane %v3903_v25, 1 }
 0x160   : > { %v1146_v38 = vadd.f32 %v1099_v11, %v1021_v28  ;;  %v1259_v37 = vsel %vm959_vm3, %v1256_v12, %v3898_v9  ;;  %v1383_v13 = vsel %vm1084_vm4, %v1380_v26, %v3900_v43  ;;  %v3906_v2 = vrot.slane %v3905_v21, 1 }
 0x161   : > { %v1543_v58 = vsel %vm959_vm3, %v1540_v56, %v3902_v3  ;;  %v1101_v59 = vrot.slane %v3907_v54, 2  ;;  %v1713_v12 = vadd.f32 %v1665_v6, %v1589_v62  ;;  %v1206_v26 = vmul.f32 %v2673_v49, %v2902_v15  ;;  %v3911_v3 = vld [vmem:[#allocation37_spill] sm:$0xff]  ;;  %v3912_v54 = vld [vmem:[#allocation36_spill] sm:$0xff] }
 0x162   : > { %v977_v16 = vsel %vm959_vm3, %v3906_v2, %v3904_v10  ;;  %v1182_v18 = vadd.f32 %v1166_v32, %v1146_v38  ;;  %v3910_v34 = vrot.slane %v3909_v17, 2  ;;  %v1207_v56 = vmul.f32 %v2673_v49, %v2899_v50 }
 0x163   : > { %v1022_v35 = vadd.f32 %v977_v16, %v3908_v27  ;;  %v1330_v41 = vmul.f32 %v2675_v51, %v2902_v15  ;;  %v1331_v45 = vmul.f32 %v2675_v51, %v2899_v50  ;;  %v1745_v6 = vmul.f32 0.70710677, %v1713_v12 }
 0x164   : > { %v1102_v28 = vsel %vm1084_vm4, %v3910_v34, %v1101_v59  ;;  %v1306_v11 = vadd.f32 %v1259_v37, %v1182_v18  ;;  %v1167_v62 = vmul.f32 %v2677_v52, %v2902_v15  ;;  %v1260_v38 = vrot.slane %v1206_v26, 1  ;;  %v2439_v21 = vpop.eup %2438 }
 0x165   : > { %v1147_v32 = vadd.f32 %v1102_v28, %v1022_v35  ;;  %v1261_v8 = vrot.slane %v1207_v56, 1  ;;  %v1384_v9 = vrot.slane %v1330_v41, 2  ;;  %v1385_v33 = vrot.slane %v1331_v45, 2 }
 0x166   : > { %2442 = verf.f32 %v1745_v6  ;;  %v1430_v43 = vadd.f32 %v1383_v13, %v1306_v11  ;;  %v1451_v10 = vmul.f32 %v2683_v63, %v3911_v3  ;;  %v1490_v37 = vmul.f32 %v2679_v53, %v3911_v3 }
 0x167   : > { %v1183_v29 = vadd.f32 %v1167_v62, %v1147_v32  ;;  %v1262_v2 = vsel %vm959_vm3, %v1260_v38, %v1261_v8  ;;  %v1386_v16 = vsel %vm1084_vm4, %v1384_v9, %v1385_v33  ;;  %v1491_v15 = vmul.f32 %v2679_v53, %v3912_v54  ;;  %v3913_v32 = vld [vmem:[#allocation16_spill] sm:$0xff] }
 0x168   : > { %v1775_v18 = vadd.f32 1.0, %v2439_v21  ;;  %v1466_v27 = vadd.f32 %v1450_v47, %v1430_v43  ;;  %v1614_v13 = vmul.f32 %v2681_v61, %v3911_v3  ;;  %v1544_v26 = vrot.slane %v1490_v37, 1  ;;  %v3915_v43 = vld [vmem:[#allocation2_spill] sm:$0xff] }
 0x169   : > { %v1307_v35 = vadd.f32 %v1262_v2, %v1183_v29  ;;  %v1545_v17 = vrot.slane %v1491_v15, 1  ;;  %v3415_v34 = vmul.f32 %v2681_v61, %v3912_v54  ;;  %v898_v28 = vmul.f32 %v2671_v48, %v2835_v20  ;;  %v3918_v15 = vld [vmem:[#allocation3_spill] sm:$0xff] }
 0x16a   : > { %v1791_v56 = vmul.f32 %v1775_v18, %v1727_v0  ;;  %v1590_v41 = vadd.f32 %v1543_v58, %v1466_v27  ;;  %v1668_v6 = vrot.slane %v1614_v13, 2  ;;  %v2441_v11 = vpop.eup %2440  ;;  %v1728_v47 = vmul.f32 0.5, %v3343_v30 }
 0x16b   : > { %v1431_v45 = vadd.f32 %v1386_v16, %v1307_v35  ;;  %v3914_v62 = vrot.slane %v3913_v32, 2  ;;  %v1669_v9 = vrot.slane %v3415_v34, 2  ;;  %v3916_v29 = vrot.slane %v3915_v43, 1 }
 0x16c   : > { %v3917_v21 = vrot.slane %v3903_v25, 1  ;;  %2319 = vmatprep.mubr.msk.f32.mxu1 %vm1807_vm5, %v1791_v56  ;;  %v1776_v20 = vadd.f32 1.0, %v2441_v11  ;;  %v1729_v37 = vmul.f32 0.5, %v1713_v12  ;;  %v1546_v30 = vsel %vm959_vm3, %v1544_v26, %v1545_v17  ;;  %v3922_v26 = vld [vmem:[#allocation14_spill] sm:$0xff] }
 0x16d   : > { %v1667_v38 = vsel %vm1084_vm4, %v1664_v40, %v3914_v62  ;;  %v1467_v58 = vadd.f32 %v1451_v10, %v1431_v45  ;;  %v1670_v40 = vsel %vm1084_vm4, %v1668_v6, %v1669_v9  ;;  %v3919_v18 = vrot.slane %v3918_v15, 2  ;;  %v3920_v10 = vld [vmem:[#allocation13_spill] sm:$0xff] }
 0x16e   : > { %v979_v2 = vsel %vm959_vm3, %v3917_v21, %v3916_v29  ;;  %v1714_v0 = vadd.f32 %v1667_v38, %v1590_v41  ;;  %v1792_v25 = vmul.f32 %v1776_v20, %v1728_v47  ;;  %v1168_v56 = vmul.f32 %v2677_v52, %v2899_v50  ;;  %v3924_v47 = vld [vmem:[#allocation18_spill] sm:$0xff]  ;;  %v3926_v62 = vld [vmem:[#allocation17_spill] sm:$0xff] }
 0x16f   : > { %v1023_v16 = vadd.f32 %v979_v2, %v898_v28  ;;  %v1104_v27 = vsel %vm1084_vm4, %v1101_v59, %v3919_v18  ;;  %v1591_v13 = vadd.f32 %v1546_v30, %v1467_v58  ;;  %v3921_v28 = vrot.slane %v3920_v10, 1  ;;  %v3928_v29 = vld [vmem:[#allocation21_spill] sm:$0xff]  ;;  %v3929_v2 = vld [vmem:[#allocation26_spill] sm:$0xff]  ;;  %v3931_v58 = vld [vmem:[#allocation20_spill] sm:$0xff] }
 0x170   : > { %v1746_v35 = vmul.f32 0.70710677, %v1714_v0  ;;  %v3923_v45 = vrot.slane %v3922_v26, 2  ;;  %v1452_v6 = vmul.f32 %v2683_v63, %v3912_v54  ;;  %2320 = vmatmul.mubr.msk.f32.gmra.mxu1 %vm1807_vm5, %v1792_v25  ;;  %v3925_v32 = vrot.slane %v3924_v47, 1 }
 0x171   : > { %v1148_v41 = vadd.f32 %v1104_v27, %v1023_v16  ;;  %v1264_v12 = vsel %vm959_vm3, %v1261_v8, %v3921_v28  ;;  %v1715_v59 = vadd.f32 %v1670_v40, %v1591_v13  ;;  %v3927_v38 = vrot.slane %v3926_v62, 1  ;;  %v3932_v40 = vld [vmem:[#allocation19_spill] sm:$0xff] }
 0x172   : > { %v1388_v11 = vsel %vm1084_vm4, %v1385_v33, %v3923_v45  ;;  %2444 = verf.f32 %v1746_v35  ;;  %v1106_v21 = vrot.slane %v3928_v29, 2  ;;  %v3930_v20 = vrot.slane %v3929_v2, 1 }
 0x173   : > { %v982_v43 = vsel %vm959_vm3, %v3927_v38, %v3925_v32  ;;  %v1184_v8 = vadd.f32 %v1168_v56, %v1148_v41  ;;  %v1209_v30 = vmul.f32 %v2673_v49, %v3911_v3  ;;  %v1747_v15 = vmul.f32 0.70710677, %v1715_v59  ;;  %v2443_v13 = vpop.eup %2442 }
 0x174   : > { %v1548_v33 = vsel %vm959_vm3, %v1545_v17, %v3930_v20  ;;  %v1024_v16 = vadd.f32 %v982_v43, %v3931_v58  ;;  %v3933_v18 = vrot.slane %v3932_v40, 2  ;;  %v1169_v25 = vmul.f32 %v2677_v52, %v3911_v3 }
 0x175   : > { %v1210_v35 = vmul.f32 %v2673_v49, %v3912_v54  ;;  %v1308_v56 = vadd.f32 %v1264_v12, %v1184_v8  ;;  %v1265_v17 = vrot.slane %v1209_v30, 1  ;;  %v1333_v10 = vmul.f32 %v2675_v51, %v3911_v3 }
 0x176   : > { %v1107_v27 = vsel %vm1084_vm4, %v3933_v18, %v1106_v21  ;;  %v1777_v28 = vadd.f32 1.0, %v2443_v13  ;;  %2446 = verf.f32 %v1747_v15  ;;  %v1334_v45 = vmul.f32 %v2675_v51, %v3912_v54 }
 0x177   : > { %v1149_v41 = vadd.f32 %v1107_v27, %v1024_v16  ;;  %v1266_v26 = vrot.slane %v1210_v35, 1  ;;  %v1432_v32 = vadd.f32 %v1388_v11, %v1308_v56  ;;  %v1389_v38 = vrot.slane %v1333_v10, 2  ;;  %v3934_v35 = vld [vmem:[#allocation27_spill] sm:$0xff] }
 0x178   : > { %v1453_v43 = vmul.f32 %v2683_v63, %v3127_v1  ;;  %v1793_v29 = vmul.f32 %v1777_v28, %v1729_v37  ;;  %v1390_v8 = vrot.slane %v1334_v45, 2  ;;  %v1493_v2 = vmul.f32 %v2679_v53, %v3127_v1 }
 0x179   : > { %v1185_v62 = vadd.f32 %v1169_v25, %v1149_v41  ;;  %v1267_v12 = vsel %vm959_vm3, %v1265_v17, %v1266_v26  ;;  %v1468_v3 = vadd.f32 %v1452_v6, %v1432_v32  ;;  %v1494_v58 = vmul.f32 %v2679_v53, %v3131_v7  ;;  %v3936_v17 = vld [vmem:[#allocation11_spill] sm:$0xff] }
 0x17a   : > { %v1617_v11 = vmul.f32 %v2681_v61, %v3127_v1  ;;  %2322 = vmatprep.mubr.msk.f32.mxu1 %vm1807_vm5, %v1793_v29  ;;  %v1391_v16 = vsel %vm1084_vm4, %v1389_v38, %v1390_v8  ;;  %v1549_v30 = vrot.slane %v1493_v2, 1  ;;  %v1618_v37 = vmul.f32 %v2681_v61, %v3131_v7  ;;  %v3939_v29 = vld [vmem:[#allocation12_spill] sm:$0xff] }
 0x17b   : > { %v1309_v20 = vadd.f32 %v1267_v12, %v1185_v62  ;;  %v900_v15 = vmul.f32 %v2671_v48, %v2899_v50  ;;  %v1592_v40 = vadd.f32 %v1548_v33, %v1468_v3  ;;  %v1550_v18 = vrot.slane %v1494_v58, 1 }
 0x17c   : > { %v1673_v27 = vrot.slane %v1617_v11, 2  ;;  %v1730_v25 = vmul.f32 0.5, %v1714_v0  ;;  %v3935_v13 = vrot.slane %v3934_v35, 2  ;;  %v1674_v41 = vrot.slane %v1618_v37, 2 }
 0x17d   : > { %v1433_v6 = vadd.f32 %v1391_v16, %v1309_v20  ;;  %v3937_v10 = vrot.slane %v3936_v17, 1  ;;  %v3938_v28 = vrot.slane %v3924_v47, 1  ;;  %v1731_v32 = vmul.f32 0.5, %v1715_v59  ;;  %v3941_v20 = vld [vmem:[#allocation24_spill] sm:$0xff]  ;;  %v3943_v16 = vld [vmem:[#allocation25_spill] sm:$0xff] }
 0x17e   : > { %v1672_v56 = vsel %vm1084_vm4, %v1669_v9, %v3935_v13  ;;  %v1551_v0 = vsel %vm959_vm3, %v1549_v30, %v1550_v18  ;;  %v1675_v38 = vsel %vm1084_vm4, %v1673_v27, %v1674_v41  ;;  %v3940_v34 = vrot.slane %v3939_v29, 2  ;;  %v3947_v13 = vld [vmem:[#allocation40_spill] sm:$0xff] }
 0x17f   : > { %v984_v45 = vsel %vm959_vm3, %v3938_v28, %v3937_v10  ;;  %v3496_v50 = vadd.f32 %v1672_v56, %v1592_v40  ;;  %v1469_v33 = vadd.f32 %v1453_v43, %v1433_v6  ;;  %v1170_v12 = vmul.f32 %v2677_v52, %v3912_v54  ;;  %v2445_v2 = vpop.eup %2444 }
 0x180   : > { %v1025_v62 = vadd.f32 %v984_v45, %v900_v15  ;;  %v1109_v9 = vsel %vm1084_vm4, %v1106_v21, %v3940_v34  ;;  %v3942_v58 = vrot.slane %v3941_v20, 1  ;;  %v1778_v11 = vadd.f32 1.0, %v2445_v2 }
 0x181   : > { %v1748_v47 = vmul.f32 0.70710677, %v3496_v50  ;;  %v1593_v3 = vadd.f32 %v1551_v0, %v1469_v33  ;;  %v3944_v30 = vrot.slane %v3943_v16, 2  ;;  %v1454_v21 = vmul.f32 %v2683_v63, %v3131_v7 }
 0x182   : > { %v1150_v59 = vadd.f32 %v1109_v9, %v1025_v62  ;;  %v1269_v43 = vsel %vm959_vm3, %v1266_v26, %v3942_v58  ;;  %v3945_v15 = vrot.slane %v3081_v22, 1  ;;  %v3946_v40 = vrot.slane %v3077_v14, 1 }
 0x183   : > { %v1393_v37 = vsel %vm1084_vm4, %v1390_v8, %v3944_v30  ;;  %2448 = verf.f32 %v1748_v47  ;;  %v1717_v27 = vadd.f32 %v1675_v38, %v1593_v3  ;;  %v1794_v26 = vmul.f32 %v1778_v11, %v1730_v25  ;;  %v3949_v8 = vld [vmem:[#allocation41_spill] sm:$0xff]  ;;  %v2447_v33 = vpop.eup %2446  ;;  %v3951_v3 = vld [vmem:[#allocation44_spill] sm:$0xff]  ;;  %v3953_v30 = vld [vmem:[#allocation54_spill] sm:$0xff] }
 0x184   : > { %v987_v6 = vsel %vm959_vm3, %v3946_v40, %v3945_v15  ;;  %v1186_v35 = vadd.f32 %v1170_v12, %v1150_v59  ;;  %v3948_v17 = vrot.slane %v3118_v42, 1  ;;  %v1111_v28 = vrot.slane %v3949_v8, 2  ;;  %v3954_v15 = vld [vmem:[#allocation53_spill] sm:$0xff] }
 0x185   : > { %v1026_v56 = vadd.f32 %v987_v6, %v3947_v13  ;;  %v1212_v45 = vmul.f32 %v2673_v49, %v3127_v1  ;;  %v1749_v62 = vmul.f32 0.70710677, %v1717_v27  ;;  %v1171_v0 = vmul.f32 %v2677_v52, %v3127_v1  ;;  %2323 = vmatmul.mubr.msk.f32.gmra.mxu1 %vm1807_vm5, %v1794_v26 }
 0x186   : > { %v1553_v10 = vsel %vm959_vm3, %v1550_v18, %v3948_v17  ;;  %v1310_v14 = vadd.f32 %v1269_v43, %v1186_v35  ;;  %v1213_v38 = vmul.f32 %v2673_v49, %v3131_v7  ;;  %v1779_v25 = vadd.f32 1.0, %v2447_v33 }
 0x187   : > { %v3950_v42 = vrot.slane %v3085_v5, 2  ;;  %v1270_v29 = vrot.slane %v1212_v45, 1  ;;  %v1336_v34 = vmul.f32 %v2675_v51, %v3127_v1  ;;  %2450 = verf.f32 %v1749_v62  ;;  %v3955_v62 = vld [vmem:[#allocation22_spill] sm:$0xff] }
 0x188   : > { %v1434_v9 = vadd.f32 %v1393_v37, %v1310_v14  ;;  %v1271_v2 = vrot.slane %v1213_v38, 1  ;;  %v1795_v47 = vmul.f32 %v1779_v25, %v1731_v32  ;;  %v3952_v59 = vrot.slane %v3951_v3, 2 }
 0x189   : > { %v1112_v18 = vsel %vm1084_vm4, %v3950_v42, %v1111_v28  ;;  %v1337_v58 = vmul.f32 %v2675_v51, %v3131_v7  ;;  %v1394_v43 = vrot.slane %v1336_v34, 2  ;;  %v1496_v1 = vmul.f32 %v2679_v53, %v3953_v30 }
 0x18a   : > { %v1151_v12 = vadd.f32 %v1112_v18, %v1026_v56  ;;  %v1677_v20 = vsel %vm1084_vm4, %v1674_v41, %v3952_v59  ;;  %v1470_v5 = vadd.f32 %v1454_v21, %v1434_v9  ;;  %v1272_v16 = vsel %vm959_vm3, %v1270_v29, %v1271_v2  ;;  %2325 = vmatprep.mubr.msk.f32.mxu1 %vm1807_vm5, %v1795_v47  ;;  %v3958_v9 = vld [vmem:[#allocation23_spill] sm:$0xff] }
 0x18b   : > { %v1395_v37 = vrot.slane %v1337_v58, 2  ;;  %v3547_v32 = vmul.f32 %v2679_v53, %v3954_v15  ;;  %v1620_v41 = vmul.f32 %v2681_v61, %v3953_v30  ;;  %v3553_v40 = vmul.f32 %v2681_v61, %v3954_v15 }
 0x18c   : > { %v1187_v11 = vadd.f32 %v1171_v0, %v1151_v12  ;;  %v1594_v21 = vadd.f32 %v1553_v10, %v1470_v5  ;;  %v1554_v35 = vrot.slane %v1496_v1, 1  ;;  %v902_v13 = vmul.f32 %v2671_v48, %v3912_v54 }
 0x18d   : > { %v1396_v56 = vsel %vm1084_vm4, %v1394_v43, %v1395_v37  ;;  %v1555_v26 = vrot.slane %v3547_v32, 1  ;;  %v1678_v17 = vrot.slane %v1620_v41, 2  ;;  %v1679_v53 = vrot.slane %v3553_v40, 2  ;;  %v3964_v41 = vld [vmem:[#allocation47_spill] sm:$0xff] }
 0x18e   : > { %v1311_v6 = vadd.f32 %v1272_v16, %v1187_v11  ;;  %v3560_v8 = vadd.f32 %v1677_v20, %v1594_v21  ;;  %v1455_v33 = vmul.f32 %v2683_v63, %v3953_v30  ;;  %v3956_v10 = vrot.slane %v3955_v62, 1  ;;  %v3962_v11 = vld [vmem:[#allocation43_spill] sm:$0xff] }
 0x18f   : > { %v3957_v14 = vrot.slane %v3081_v22, 1  ;;  %v1559_v54 = vrot.slane %v3262_v39, 1  ;;  %v1732_v38 = vmul.f32 0.5, %v3496_v50  ;;  %v1733_v25 = vmul.f32 0.5, %v1717_v27  ;;  %v3960_v27 = vld [vmem:[#allocation42_spill] sm:$0xff] }
 0x190   : > { %v1435_v45 = vadd.f32 %v1396_v56, %v1311_v6  ;;  %v1750_v18 = vmul.f32 0.70710677, %v3560_v8  ;;  %v1556_v34 = vsel %vm959_vm3, %v1554_v35, %v1555_v26  ;;  %v3959_v12 = vrot.slane %v3958_v9, 2  ;;  %v2449_v3 = vpop.eup %2448  ;;  %v3966_v6 = vld [vmem:[#allocation45_spill] sm:$0xff] }
 0x191   : > { %v989_v0 = vsel %vm959_vm3, %v3957_v14, %v3956_v10  ;;  %v1680_v22 = vsel %vm1084_vm4, %v1678_v17, %v1679_v53  ;;  %v1172_v50 = vmul.f32 %v2677_v52, %v3131_v7  ;;  %v3961_v20 = vrot.slane %v3960_v27, 1  ;;  %v3968_v56 = vld [vmem:[#allocation49_spill] sm:$0xff] }
 0x192   : > { %v1027_v42 = vadd.f32 %v989_v0, %v902_v13  ;;  %v1471_v29 = vadd.f32 %v1455_v33, %v1435_v45  ;;  %v1114_v47 = vsel %vm1084_vm4, %v1111_v28, %v3959_v12  ;;  %v1780_v43 = vadd.f32 1.0, %v2449_v3  ;;  %v3969_v33 = vld [vmem:[#allocation46_spill] sm:$0xff]  ;;  %v3970_v0 = vld [vmem:[#allocation48_spill] sm:$0xff] }
 0x193   : > { %v1274_v58 = vsel %vm959_vm3, %v1271_v2, %v3961_v20  ;;  %2452 = verf.f32 %v1750_v18  ;;  %v3963_v16 = vrot.slane %v3962_v11, 2  ;;  %v1456_v32 = vmul.f32 %v2683_v63, %v3954_v15 }
 0x194   : > { %v1152_v59 = vadd.f32 %v1114_v47, %v1027_v42  ;;  %v1595_v5 = vadd.f32 %v1556_v34, %v1471_v29  ;;  %v3965_v21 = vrot.slane %v3964_v41, 1  ;;  %v3967_v35 = vrot.slane %v3966_v6, 1  ;;  %v2451_v10 = vpop.eup %2450 }
 0x195   : > { %v1398_v28 = vsel %vm1084_vm4, %v1395_v37, %v3963_v16  ;;  %v1116_v17 = vrot.slane %v3968_v56, 2  ;;  %v1796_v2 = vmul.f32 %v1780_v43, %v1732_v38  ;;  %v1215_v37 = vmul.f32 %v2673_v49, %v3953_v30  ;;  %v3972_v16 = vld [vmem:[#allocation52_spill] sm:$0xff] }
 0x196   : > { %v1188_v1 = vadd.f32 %v1172_v50, %v1152_v59  ;;  %v992_v13 = vsel %vm959_vm3, %v3967_v35, %v3965_v21  ;;  %v3595_v45 = vadd.f32 %v1680_v22, %v1595_v5  ;;  %v3971_v42 = vrot.slane %v3970_v0, 2 }
 0x197   : > { %v1028_v62 = vadd.f32 %v992_v13, %v3969_v33  ;;  %v1216_v29 = vmul.f32 %v2673_v49, %v3954_v15  ;;  %v1339_v34 = vmul.f32 %v2675_v51, %v3953_v30  ;;  %2326 = vmatmul.mubr.msk.f32.gmra.mxu1 %vm1807_vm5, %v1796_v2  ;;  %v1781_v38 = vadd.f32 1.0, %v2451_v10 }
 0x198   : > { %v1312_v14 = vadd.f32 %v1274_v58, %v1188_v1  ;;  %v1117_v18 = vsel %vm1084_vm4, %v3971_v42, %v1116_v17  ;;  %v1751_v9 = vmul.f32 0.70710677, %v3595_v45  ;;  %v1173_v47 = vmul.f32 %v2677_v52, %v3953_v30  ;;  %v3982_v42 = vld [vmem:[#allocation56_spill] sm:$0xff] }
 0x199   : > { %v1153_v12 = vadd.f32 %v1117_v18, %v1028_v62  ;;  %v1275_v22 = vrot.slane %v1215_v37, 1  ;;  %v1276_v59 = vrot.slane %v1216_v29, 1  ;;  %v1340_v50 = vmul.f32 %v2675_v51, %v3954_v15  ;;  %v3978_v37 = vld [vmem:[#allocation39_spill] sm:$0xff]  ;;  %v3984_v18 = vld [vmem:[#allocation58_spill] sm:$0xff] }
 0x19a   : > { %v1436_v3 = vadd.f32 %v1398_v28, %v1312_v14  ;;  %v1797_v27 = vmul.f32 %v1781_v38, %v1733_v25  ;;  %2454 = verf.f32 %v1751_v9  ;;  %v1399_v20 = vrot.slane %v1339_v34, 2  ;;  %v3974_v25 = vld [vmem:[#allocation38_spill] sm:$0xff] }
 0x19b   : > { %v1189_v49 = vadd.f32 %v1173_v47, %v1153_v12  ;;  %v1560_v58 = vrot.slane %v3266_v60, 1  ;;  %v1277_v5 = vsel %vm959_vm3, %v1275_v22, %v1276_v59  ;;  %v1400_v11 = vrot.slane %v1340_v50, 2  ;;  %v3988_v47 = vld [vmem:[#allocation33_spill] sm:$0xff] }
 0x19c   : > { %v1472_v43 = vadd.f32 %v1456_v32, %v1436_v3  ;;  %2328 = vmatprep.mubr.msk.f32.mxu1 %vm1807_vm5, %v1797_v27  ;;  %v3973_v30 = vrot.slane %v3972_v16, 1  ;;  %v904_v51 = vmul.f32 %v2671_v48, %v3131_v7  ;;  %v3975_v21 = vrot.slane %v3974_v25, 1  ;;  %v3989_v22 = vld [vmem:[#allocation57_spill] sm:$0xff]  ;;  %v3992_v16 = vld [vmem:[#allocation55_spill] sm:$0xff] }
 0x19d   : > { %v1313_v1 = vadd.f32 %v1277_v5, %v1189_v49  ;;  %v3976_v6 = vrot.slane %v3964_v41, 1  ;;  %v1683_v32 = vrot.slane %v3278_v55, 2  ;;  %v1401_v13 = vsel %vm1084_vm4, %v1399_v20, %v1400_v11  ;;  %v3995_v25 = vld [vmem:[#allocation35_spill] sm:$0xff] }
 0x19e   : > { %v1558_v28 = vsel %vm959_vm3, %v1555_v26, %v3973_v30  ;;  %v1684_v56 = vrot.slane %v3356_v44, 2  ;;  %v1192_v26 = vadd.f32 %v3246_v31, %v3242_v36  ;;  %v3977_v2 = vrot.slane %v3193_v24, 2 }
 0x19f   : > { %v994_v60 = vsel %vm959_vm3, %v3976_v6, %v3975_v21  ;;  %v1596_v35 = vadd.f32 %v1558_v28, %v1472_v43  ;;  %v1437_v7 = vadd.f32 %v1401_v13, %v1313_v1  ;;  %v1734_v33 = vmul.f32 0.5, %v3560_v8  ;;  %v3993_v1 = vld [vmem:[#allocation51_spill] sm:$0xff] }
 0x1a0   : > { %v1682_v48 = vsel %vm1084_vm4, %v1679_v53, %v3977_v2  ;;  %v1029_v41 = vadd.f32 %v994_v60, %v904_v51  ;;  %v1561_v55 = vsel %vm959_vm3, %v1559_v54, %v1560_v58  ;;  %v3979_v44 = vrot.slane %v3978_v37, 2  ;;  %v2453_v14 = vpop.eup %2452  ;;  %v3996_v60 = vld [vmem:[#allocation32_spill] sm:$0xff] }
 0x1a1   : > { %v1720_v62 = vadd.f32 %v1682_v48, %v1596_v35  ;;  %v1473_v36 = vadd.f32 %v3249_v46, %v1437_v7  ;;  %v1174_v31 = vmul.f32 %v2677_v52, %v3954_v15  ;;  %v3980_v40 = vrot.slane %v3230_v23, 2  ;;  %v3998_v35 = vld [vmem:[#allocation31_spill] sm:$0xff] }
 0x1a2   : > { %v1119_v10 = vsel %vm1084_vm4, %v1116_v17, %v3979_v44  ;;  %v3981_v53 = vrot.slane %v3226_v19, 2  ;;  %v1685_v54 = vsel %vm1084_vm4, %v1683_v32, %v1684_v56  ;;  %v3983_v17 = vrot.slane %v3982_v42, 1  ;;  %v3986_v19 = vld [vmem:[#allocation50_spill] sm:$0xff] }
 0x1a3   : > { %v1154_v24 = vadd.f32 %v1119_v10, %v1029_v41  ;;  %v1752_v39 = vmul.f32 0.70710677, %v1720_v62  ;;  %v3985_v46 = vrot.slane %v3984_v18, 1  ;;  %v1782_v34 = vadd.f32 1.0, %v2453_v14  ;;  %v4002_v41 = vld [vmem:[#allocation28_spill] sm:$0xff] }
 0x1a4   : > { %v1406_v8 = vsel %vm1084_vm4, %v3981_v53, %v3980_v40  ;;  %v1597_v52 = vadd.f32 %v1561_v55, %v1473_v36  ;;  %v3987_v9 = vrot.slane %v3986_v19, 1  ;;  %v3990_v50 = vrot.slane %v3989_v22, 2  ;;  %v4004_v55 = vld [vmem:[#allocation30_spill] sm:$0xff] }
 0x1a5   : > { %v1439_v0 = vadd.f32 %v1406_v8, %v3275_v57  ;;  %v1284_v29 = vsel %vm959_vm3, %v3985_v46, %v3983_v17  ;;  %v1190_v15 = vadd.f32 %v1174_v31, %v1154_v24  ;;  %2456 = verf.f32 %v1752_v39  ;;  %v4006_v8 = vld [vmem:[#allocation29_spill] sm:$0xff] }
 0x1a6   : > { %v1316_v38 = vadd.f32 %v1284_v29, %v1192_v26  ;;  %v1279_v12 = vsel %vm959_vm3, %v1276_v59, %v3987_v9  ;;  %v3991_v57 = vmov %v3980_v40  ;;  %v1798_v49 = vmul.f32 %v1782_v34, %v1734_v33 }
 0x1a7   : > { %v1475_v3 = vadd.f32 %v3988_v47, %v1439_v0  ;;  %v1408_v27 = vsel %vm1084_vm4, %v3991_v57, %v3990_v50  ;;  %v1721_v20 = vadd.f32 %v1685_v54, %v1597_v52  ;;  %v1314_v43 = vadd.f32 %v1279_v12, %v1190_v15  ;;  %v2455_v48 = vpop.eup %2454 }
 0x1a8   : > { %v1440_v5 = vadd.f32 %v1408_v27, %v1316_v38  ;;  %v1625_v30 = vmul.f32 %v2681_v61, %v3992_v16  ;;  %v1458_v28 = vmul.f32 %v2683_v63, %v3200_v4  ;;  %v3994_v59 = vrot.slane %v3993_v1, 2  ;;  %2329 = vmatmul.mubr.msk.f32.gmra.mxu1 %vm1807_vm5, %v1798_v49  ;;  %v4000_v61 = vld [vmem:[#allocation34_spill] sm:$0xff]  ;;  %v4001_v63 = vld [vmem:[#allocation59_spill] sm:$0xff] }
 0x1a9   : > { %v1599_v21 = vadd.f32 %v3995_v25, %v1475_v3  ;;  %v1753_v23 = vmul.f32 0.70710677, %v1721_v20  ;;  %v3997_v32 = vrot.slane %v3996_v60, 2  ;;  %v3999_v13 = vrot.slane %v3998_v35, 2 }
 0x1aa   : > { %v1403_v51 = vsel %vm1084_vm4, %v1400_v11, %v3994_v59  ;;  %v1476_v2 = vadd.f32 %v4000_v61, %v1440_v5  ;;  %v1562_v4 = vrot.slane %v4001_v63, 1  ;;  %v1735_v7 = vmul.f32 0.5, %v3595_v45 }
 0x1ab   : > { %v1438_v6 = vadd.f32 %v1403_v51, %v1314_v43  ;;  %v1690_v26 = vsel %vm1084_vm4, %v3999_v13, %v3997_v32  ;;  %v4003_v33 = vrot.slane %v4002_v41, 1  ;;  %v4005_v37 = vrot.slane %v4004_v55, 1 }
 0x1ac   : > { %v1723_v11 = vadd.f32 %v1690_v26, %v1599_v21  ;;  %v1783_v10 = vadd.f32 1.0, %v2455_v48  ;;  %2458 = verf.f32 %v1753_v23  ;;  %v1686_v31 = vrot.slane %v1625_v30, 2 }
 0x1ad   : > { %v1568_v44 = vsel %vm959_vm3, %v4005_v37, %v4003_v33  ;;  %v1474_v36 = vadd.f32 %v1458_v28, %v1438_v6  ;;  %v1563_v40 = vsel %vm959_vm3, %v1560_v58, %v1562_v4  ;;  %v4007_v14 = vrot.slane %v4006_v8, 2 }
 0x1ae   : > { %v1600_v24 = vadd.f32 %v1568_v44, %v1476_v2  ;;  %v1755_v53 = vmul.f32 0.70710677, %v1723_v11  ;;  %v4008_v39 = vmov %v3997_v32  ;;  %v1799_v54 = vmul.f32 %v1783_v10, %v1735_v7 }
 0x1af   : > { %v1692_v45 = vsel %vm1084_vm4, %v4008_v39, %v4007_v14  ;;  %v1598_v0 = vadd.f32 %v1563_v40, %v1474_v36  ;;  %v1687_v17 = vsel %vm1084_vm4, %v1684_v56, %v1686_v31  ;;  %v1736_v34 = vmul.f32 0.5, %v1720_v62 }
 0x1b0   : > { %v1724_v42 = vadd.f32 %v1692_v45, %v1600_v24  ;;  %2460 = verf.f32 %v1755_v53  ;;  %2331 = vmatprep.mubr.msk.f32.mxu1 %vm1807_vm5, %v1799_v54  ;;  %v1737_v19 = vmul.f32 0.5, %v1721_v20  ;;  %v1739_v50 = vmul.f32 0.5, %v1723_v11 }
 0x1b1   : > { %v1722_v18 = vadd.f32 %v1687_v17, %v1598_v0 }
 0x1b2   : > { %v1756_v46 = vmul.f32 0.70710677, %v1724_v42  ;;  %v2457_v58 = vpop.eup %2456  ;;  %v1740_v5 = vmul.f32 0.5, %v1724_v42 }
 0x1b3   : > { %v1754_v29 = vmul.f32 0.70710677, %v1722_v18  ;;  %v1784_v52 = vadd.f32 1.0, %v2457_v58  ;;  %v1738_v57 = vmul.f32 0.5, %v1722_v18 }
 0x1b4   : > { %2462 = verf.f32 %v1756_v46 }
 0x1b5   : > { %2464 = verf.f32 %v1754_v29  ;;  %v1800_v15 = vmul.f32 %v1784_v52, %v1736_v34 }
 0x1b7   : > { %2332 = vmatmul.mubr.msk.f32.gmra.mxu1 %vm1807_vm5, %v1800_v15 }
 0x1b9   : > { %v2459_v38 = vpop.eup %2458 }
 0x1ba   : > { %v1785_v9 = vadd.f32 1.0, %v2459_v38 }
 0x1bc   : > { %v1801_v47 = vmul.f32 %v1785_v9, %v1737_v19 }
 0x1bd   : > { %v2461_v12 = vpop.eup %2460 }
 0x1be   : > { %2334 = vmatprep.mubr.msk.f32.mxu1 %vm1807_vm5, %v1801_v47  ;;  %v1787_v3 = vadd.f32 1.0, %v2461_v12 }
 0x1c0   : > { %v1803_v62 = vmul.f32 %v1787_v3, %v1739_v50 }
 0x1c1   : > { %v2463_v56 = vpop.eup %2462 }
 0x1c2   : > { %v2465_v22 = vpop.eup %2464  ;;  %v1788_v49 = vadd.f32 1.0, %v2463_v56 }
 0x1c3   : > { %v1786_v27 = vadd.f32 1.0, %v2465_v22 }
 0x1c4   : > { %v1804_v16 = vmul.f32 %v1788_v49, %v1740_v5 }
 0x1c5   : > { %v1802_v43 = vmul.f32 %v1786_v27, %v1738_v57 }
 0x1c7   : > { %2335 = vmatmul.mubr.msk.f32.gmra.mxu1 %vm1807_vm5, %v1802_v43 }
 0x1c8   : > { %2337 = vmatprep.mubr.msk.f32.mxu1 %vm1807_vm5, %v1803_v62 }
 0x1cb   : > { %2338 = vmatmul.mubr.msk.f32.gmra.mxu1 %vm1807_vm5, %v1804_v16 }
 0x21d   : > { %v2318_v20 = vpop.f32.mrf.mxu1 }
 0x21e   : > { %2002 = vst.msk [vmem:[%s3707_s10 + $0x8] sm:$0xff] %vm453_vm1, %v2318_v20 }
 0x21f   : > { %v1922_v30 = vpop.f32.mrf.mxu1 }
 0x220   : > { %2001 = vst.msk [vmem:[%s3707_s10] sm:$0xff] %vm453_vm1, %v1922_v30 }
 0x230   : > { %v2321_v28 = vpop.f32.mrf.mxu1 }
 0x231   : > { %2004 = vst.msk [vmem:[%s3707_s10 + $0x18] sm:$0xff] %vm453_vm1, %v2321_v28 }
 0x232   : > { %v1932_v1 = vpop.f32.mrf.mxu1 }
 0x233   : > { %2003 = vst.msk [vmem:[%s3707_s10 + $0x10] sm:$0xff] %vm453_vm1, %v1932_v1 }
 0x245   : > { %v2324_v59 = vpop.f32.mrf.mxu1 }
 0x246   : > { %2006 = vst.msk [vmem:[%s3707_s10 + $0x28] sm:$0xff] %vm453_vm1, %v2324_v59 }
 0x247   : > { %v1942_v51 = vpop.f32.mrf.mxu1 }
 0x248   : > { %2005 = vst.msk [vmem:[%s3707_s10 + $0x20] sm:$0xff] %vm453_vm1, %v1942_v51 }
 0x257   : > { %v2327_v25 = vpop.f32.mrf.mxu1 }
 0x258   : > { %2008 = vst.msk [vmem:[%s3707_s10 + $0x38] sm:$0xff] %vm453_vm1, %v2327_v25 }
 0x259   : > { %v1952_v21 = vpop.f32.mrf.mxu1 }
 0x25a   : > { %2007 = vst.msk [vmem:[%s3707_s10 + $0x30] sm:$0xff] %vm453_vm1, %v1952_v21 }
 0x268   : > { %v2330_v23 = vpop.f32.mrf.mxu1 }
 0x269   : > { %2010 = vst.msk [vmem:[%s3707_s10 + $0x48] sm:$0xff] %vm453_vm1, %v2330_v23 }
 0x26a   : > { %v1962_v6 = vpop.f32.mrf.mxu1 }
 0x26b   : > { %2009 = vst.msk [vmem:[%s3707_s10 + $0x40] sm:$0xff] %vm453_vm1, %v1962_v6 }
 0x277   : > { %v2333_v60 = vpop.f32.mrf.mxu1 }
 0x278   : > { %2012 = vst.msk [vmem:[%s3707_s10 + $0x58] sm:$0xff] %vm453_vm1, %v2333_v60 }
 0x279   : > { %v1972_v32 = vpop.f32.mrf.mxu1 }
 0x27a   : > { %2011 = vst.msk [vmem:[%s3707_s10 + $0x50] sm:$0xff] %vm453_vm1, %v1972_v32 }
 0x287   : > { %v2336_v35 = vpop.f32.mrf.mxu1 }
 0x288   : > { %2014 = vst.msk [vmem:[%s3707_s10 + $0x68] sm:$0xff] %vm453_vm1, %v2336_v35 }
 0x289   : > { %v1982_v13 = vpop.f32.mrf.mxu1 }
 0x28a   : > { %2013 = vst.msk [vmem:[%s3707_s10 + $0x60] sm:$0xff] %vm453_vm1, %v1982_v13 }
 0x28b   : > { %v2339_v26 = vpop.f32.mrf.mxu1 }
 0x28c   : > { %2016 = vst.msk [vmem:[%s3707_s10 + $0x78] sm:$0xff] %vm453_vm1, %v2339_v26 }
 0x28d   : > { %v1992_v61 = vpop.f32.mrf.mxu1 }
 0x28e   : > { %2015 = vst.msk [vmem:[%s3707_s10 + $0x70] sm:$0xff] %vm453_vm1, %v1992_v61 }
 0x28f PF: > { %s16_s25 = sadd.s32 1, %s2504_s25   ;;  %s4009_s21 = smov %s2496_s23 }
 0x290   : > { %p13_p12 = scmp.ge.s32.totalorder %s16_s25, 6   ;;  %s4010_s22 = smov %s2500_s24 }
 0x291   : > { %s4011_s23 = smov %s4014_s26  ;;  %s4012_s24 = smov %s4018_s27 }
 0x292   :  { %15 = sbr.rel (!%p13_p12) target bundleno = 3 (0x3), region = 80 }

</bundles_post_ra>
